<compile_context>
chip_gen: v7x
topology: tpu7x:2x2x1
jax: 0.10.0
libtpu: 0.0.40
codegen_flags: <defaults>
</compile_context>

<pallas_src>
import functools

import jax
import jax.numpy as jnp
from jax.experimental import pallas as pl
from jax.experimental.pallas import tpu as pltpu


def _round_up(x, m):
    return (x + m - 1) // m * m


# --------------------------------------------------------------------------
# Plain-JAX glue: adjacency normalization + weight fusion.
# --------------------------------------------------------------------------
def _normalize_adjacency(edge_index, edge_weight, num_nodes):
    """Dense GCN normalization D^-1/2 (A + I) D^-1/2 (PyG GCNConv semantics).

    Note: the dense scatter-add sums duplicate edges; matches PyG only for
    duplicate-free edge lists.
    """
    src = edge_index[0]
    dst = edge_index[1]
    A = jnp.zeros((num_nodes, num_nodes), jnp.float32)
    A = A.at[dst, src].add(edge_weight.astype(jnp.float32))
    A = A + jnp.eye(num_nodes, dtype=jnp.float32)
    deg = A.sum(axis=1)
    dinv = jnp.where(deg > 0, jax.lax.rsqrt(deg), 0.0)
    return dinv[:, None] * A * dinv[None, :]


def _fuse_params(params, filters):
    """Fold conv weights/biases into the gate Linears (done once per call)."""
    F = filters

    def t(w):
        return jnp.transpose(w).astype(jnp.float32)

    lz, lr, lh = t(params["lin_z_w"]), t(params["lin_r_w"]), t(params["lin_h_w"])
    lza, lzb = lz[:F], lz[F:]
    lra, lrb = lr[:F], lr[F:]
    lha, lhb = lh[:F], lh[F:]

    # conv_g(x) then Linear_g([conv_g | H]) collapses to:
    #   A @ (X @ Wc_g) + bg_g + H @ L_gb     with Wc_g = Wg^T @ L_ga.
    wc = jnp.concatenate([t(params["conv_z_w"]) @ lza,
                          t(params["conv_r_w"]) @ lra,
                          t(params["conv_h_w"]) @ lha], axis=1)        # (lags, 3F)
    bg = jnp.concatenate([params["conv_z_b"] @ lza + params["lin_z_b"],
                          params["conv_r_b"] @ lra + params["lin_r_b"],
                          params["conv_h_b"] @ lha + params["lin_h_b"]])      # (3F,)
    wzr = jnp.concatenate([lzb, lrb], axis=1).astype(jnp.bfloat16)     # (F, 2F)
    whh = lhb.astype(jnp.bfloat16)                                     # (F, F)
    wo_row = params["lin_out_w"].astype(jnp.float32)                   # (1, F)
    bo = params["lin_out_b"].reshape(1, 1).astype(jnp.float32)         # (1, 1)
    return wc, bg, wzr, whh, wo_row, bo


def init_params(key, lags, filters):
    """Deterministic parameter init matching the module's shapes (PyTorch layout)."""
    ks = jax.random.split(key, 8)
    s = 0.1
    return {
        "conv_z_w": s * jax.random.normal(ks[0], (filters, lags), jnp.float32),
        "conv_z_b": jnp.zeros((filters,), jnp.float32),
        "conv_r_w": s * jax.random.normal(ks[1], (filters, lags), jnp.float32),
        "conv_r_b": jnp.zeros((filters,), jnp.float32),
        "conv_h_w": s * jax.random.normal(ks[2], (filters, lags), jnp.float32),
        "conv_h_b": jnp.zeros((filters,), jnp.float32),
        "lin_z_w": s * jax.random.normal(ks[3], (filters, 2 * filters), jnp.float32),
        "lin_z_b": s * jax.random.normal(ks[4], (filters,), jnp.float32),
        "lin_r_w": s * jax.random.normal(ks[5], (filters, 2 * filters), jnp.float32),
        "lin_r_b": jnp.zeros((filters,), jnp.float32),
        "lin_h_w": s * jax.random.normal(ks[6], (filters, 2 * filters), jnp.float32),
        "lin_h_b": jnp.zeros((filters,), jnp.float32),
        "lin_out_w": s * jax.random.normal(ks[7], (1, filters), jnp.float32),
        "lin_out_b": jnp.zeros((1,), jnp.float32),
    }


# --------------------------------------------------------------------------
# Wrappers (kernel is defined inside — it closes over the static tiling).
# --------------------------------------------------------------------------
@functools.partial(jax.jit,
                   static_argnames=("num_nodes", "filters", "row_tile", "time_chunk"))
def tgcn_forward_sequence(params, x_seq, edge_index, edge_weight, h0,
                          *, num_nodes, filters, row_tile=None, time_chunk=None):
    """Runs the module forward for every timestep of x_seq inside ONE kernel.

    x_seq: (T, N, lags).  Returns (y_seq (T, N, 1), h_final (N, F)).
    Each step is exactly TGCN_RecurrentGCN.forward(x_t, ..., h_{t-1}).
    """
    T, N, lags = x_seq.shape
    F = filters
    assert N == num_nodes

    a_hat = _normalize_adjacency(edge_index, edge_weight, N)
    wc, bg, wzr, whh, wo_row, bo = _fuse_params(params, F)

    # ---- Static tiling decisions -------------------------------------------
    TC = time_chunk if time_chunk is not None else min(8, T)     # steps / chunk
    TC = max(1, min(TC, T))
    Tp = _round_up(T, TC)
    n_chunks = Tp // TC
    WSTEP = _round_up(3 * F, 128)        # per-step lane slot, vreg aligned
    LANES = TC * WSTEP                   # chunk slab lane width

    Np8 = max(8, _round_up(N, 8))
    if row_tile is None:
        if Np8 <= 128:
            row_tile = Np8
        else:
            cap_a = max(8, ((8 << 20) // (Np8 * 2)) // 8 * 8)    # A block <= ~8 MiB
            cap_g = max(8, ((8 << 20) // (LANES * 4)) // 8 * 8)  # Gall temp <= ~8 MiB
            half = _round_up((Np8 + 1) // 2, 8)                  # >=2 tiles (v7x 2 TCs)
            row_tile = max(8, min(half, 512, cap_a, cap_g))
    tm = row_tile
    Np = _round_up(Np8, tm)
    n_row = Np // tm
    # TODO(synk): for graphs where a full-width (tm, Np) A row tile cannot fit
    # VMEM, a k-tiled (column) grid axis over A would be needed; not implemented.

    # ---- Host-side (XLA) precompute: hoist the conv weight fold over time ----
    a_pad = (jnp.zeros((Np, Np), jnp.float32).at[:N, :N].set(a_hat)
             .astype(jnp.bfloat16))
    xc = jnp.einsum("tnl,lg->tng", x_seq.astype(jnp.float32), wc)       # (T, N, 3F)
    xc_pad = jnp.zeros((Tp, Np, WSTEP), jnp.float32).at[:T, :N, :3 * F].set(xc)
    xc_slab = (xc_pad.reshape(n_chunks, TC, Np, WSTEP)
               .transpose(0, 2, 1, 3)
               .reshape(n_chunks, Np, LANES)
               .astype(jnp.bfloat16))                                   # per-chunk slab
    bg_tiled = jnp.tile(jnp.zeros((WSTEP,), jnp.float32).at[:3 * F].set(bg),
                        (TC,)).reshape(1, LANES)
    h0_pad = jnp.zeros((Np, F), jnp.float32).at[:N, :].set(h0.astype(jnp.float32))

    mask_tail = (Tp != T)

    # ---- Kernel: one (row-tile, time-chunk) grid point ----------------------
    def kernel(a_ref, xc_ref, h0_ref, bg_ref, wzr_ref, whh_ref, wo_ref, bo_ref,
               y_ref, h_ref):
        c = pl.program_id(1)

        # h_ref is the carry: constant block index over the chunk axis keeps it
        # VMEM-resident; it is flushed to HBM once per row tile.
        @pl.when(c == 0)
        def _():
            h_ref[...] = h0_ref[...]

        H = h_ref[...]                                               # (tm, F) f32

        # One lane-dense MXU pass: conv_{z,r,h} for ALL TC steps of this chunk.
        Gall = jnp.dot(a_ref[...], xc_ref[...],
                       preferred_element_type=jnp.float32) + bg_ref[...]

        lane = jax.lax.broadcasted_iota(jnp.int32, (tm, TC), 1)
        Y = jnp.zeros((tm, TC), jnp.float32)
        wo = wo_ref[...]                                             # (1, F)
        bo_v = bo_ref[...]                                           # (1, 1)

        for t in range(TC):                                          # unrolled
            base = t * WSTEP
            Gz = Gall[:, base:base + F]
            Gr = Gall[:, base + F:base + 2 * F]
            Gh = Gall[:, base + 2 * F:base + 3 * F]
            HW = jnp.dot(H.astype(jnp.bfloat16), wzr_ref[...],
                         preferred_element_type=jnp.float32)         # (tm, 2F)
            Z = jax.nn.sigmoid(Gz + HW[:, :F])
            R = jax.nn.sigmoid(Gr + HW[:, F:])
            Ht = jnp.tanh(
                Gh + jnp.dot((H * R).astype(jnp.bfloat16), whh_ref[...],
                             preferred_element_type=jnp.float32))
            Hn = Z * H + (1.0 - Z) * Ht
            if mask_tail:                                            # padded tail steps
                Hn = jnp.where(c * TC + t < T, Hn, H)
            H = Hn
            # Output Linear (F -> 1): VPU multiply + 32-lane reduce (no MXU).
            yv = jnp.sum(jnp.maximum(H, 0.0) * wo, axis=1, keepdims=True) + bo_v
            Y = jnp.where(lane == t, yv, Y)

        h_ref[...] = H           # carry for next chunk / final flush
        y_ref[...] = Y           # (tm, TC): one tiny HBM write per chunk

    # ---- pallas_call ---------------------------------------------------------
    grid = (n_row, n_chunks)
    in_specs = [
        pl.BlockSpec((tm, Np),          lambda i, c: (i, 0)),    # A rows (resident)
        pl.BlockSpec((None, Np, LANES), lambda i, c: (c, 0, 0)), # Xc chunk slab
        pl.BlockSpec((tm, F),           lambda i, c: (i, 0)),    # h0 rows
        pl.BlockSpec((1, LANES),        lambda i, c: (0, 0)),    # tiled gate bias
        pl.BlockSpec((F, 2 * F),        lambda i, c: (0, 0)),    # [Lzb | Lrb] bf16
        pl.BlockSpec((F, F),            lambda i, c: (0, 0)),    # Lhb bf16
        pl.BlockSpec((1, F),            lambda i, c: (0, 0)),    # output weight row
        pl.BlockSpec((1, 1),            lambda i, c: (0, 0)),    # output bias
    ]
    out_specs = (
        pl.BlockSpec((None, tm, TC), lambda i, c: (c, i, 0)),    # y per chunk
        pl.BlockSpec((tm, F),        lambda i, c: (i, 0)),       # final H (carry)
    )
    out_shape = (jax.ShapeDtypeStruct((n_chunks, Np, TC), jnp.float32),
                 jax.ShapeDtypeStruct((Np, F), jnp.float32))

    flops = n_row * n_chunks * (2 * tm * Np * LANES
                                + TC * (2 * tm * F * 2 * F + 2 * tm * F * F
                                        + 4 * tm * F))
    transcendentals = n_row * n_chunks * TC * 3 * tm * F
    bytes_accessed = (Np * Np * 2
                      + n_row * n_chunks * Np * LANES * 2
                      + 2 * Np * F * 4
                      + 2 * (wzr.size + whh.size)
                      + 4 * (bg_tiled.size + wo_row.size + 1)
                      + n_chunks * Np * TC * 4)

    vmem_need = (tm * Np * 2                 # resident A tile
                 + 2 * Np * LANES * 2        # double-buffered Xc slab
                 + tm * LANES * 4            # Gall temporary
                 + 2 * tm * (TC + F) * 4     # y / h blocks
                 + 8 * tm * F * 4)           # working temps
    vmem_limit = int(min(64 << 20, max(32 << 20, 2 * vmem_need)))

    y_pad, h_pad = pl.pallas_call(
        kernel,
        out_shape=out_shape,
        grid=grid,
        in_specs=in_specs,
        out_specs=out_specs,
        compiler_params=pltpu.CompilerParams(
            dimension_semantics=("parallel", "arbitrary"),
            vmem_limit_bytes=vmem_limit),
        cost_estimate=pl.CostEstimate(flops=int(flops),
                                      transcendentals=int(transcendentals),
                                      bytes_accessed=int(bytes_accessed)),
    )(a_pad, xc_slab, h0_pad, bg_tiled, wzr, whh, wo_row, bo)

    y_seq = (y_pad.transpose(0, 2, 1).reshape(Tp, Np)[:T, :N])[..., None]
    h_final = h_pad[:N, :]
    return y_seq, h_final


def tgcn_forward(params, x, edge_index, edge_weight, prev_hidden_state,
                 *, num_nodes, filters):
    """Single-step API matching TGCN_RecurrentGCN.forward -> (y, h)."""
    y_seq, h = tgcn_forward_sequence(params, x[None], edge_index, edge_weight,
                                     prev_hidden_state,
                                     num_nodes=num_nodes, filters=filters)
    return y_seq[0], h


# --------------------------------------------------------------------------
# Pure-JAX reference (torch-module math, f32, no Pallas) for correctness.
# --------------------------------------------------------------------------
def _reference_sequence(params, x_seq, edge_index, edge_weight, h0,
                        num_nodes, filters):
    a_hat = _normalize_adjacency(edge_index, edge_weight, num_nodes)
    h = h0.astype(jnp.float32)
    ys = []
    for t in range(x_seq.shape[0]):
        x = x_seq[t].astype(jnp.float32)
        ax = a_hat @ x
        conv_z = ax @ params["conv_z_w"].T + params["conv_z_b"]
        conv_r = ax @ params["conv_r_w"].T + params["conv_r_b"]
        conv_h = ax @ params["conv_h_w"].T + params["conv_h_b"]
        Z = jax.nn.sigmoid(jnp.concatenate([conv_z, h], 1) @ params["lin_z_w"].T
                           + params["lin_z_b"])
        R = jax.nn.sigmoid(jnp.concatenate([conv_r, h], 1) @ params["lin_r_w"].T
                           + params["lin_r_b"])
        Ht = jnp.tanh(jnp.concatenate([conv_h, h * R], 1) @ params["lin_h_w"].T
                      + params["lin_h_b"])
        h = Z * h + (1.0 - Z) * Ht
        ys.append(jnp.maximum(h, 0.0) @ params["lin_out_w"].T + params["lin_out_b"])
    return jnp.stack(ys, 0), h


if __name__ == "__main__":
    NUM_NODES = 16     # graph nodes
    LAGS = 4           # in_channels of the GCNConvs (feature lags)
    FILTERS = 32       # hidden size
    T = 8              # timesteps processed inside one kernel call

    key = jax.random.PRNGKey(0)
    k_param, k_x, k_w, k_h = jax.random.split(key, 4)

    params = init_params(k_param, LAGS, FILTERS)

    x_seq = jax.random.normal(k_x, (T, NUM_NODES, LAGS), jnp.float32)
    idx = jnp.arange(NUM_NODES, dtype=jnp.int32)
    src = jnp.concatenate([idx, idx])
    dst = jnp.concatenate([(idx + 1) % NUM_NODES, (idx - 1) % NUM_NODES])
    edge_index = jnp.stack([src, dst], axis=0)                       # (2, 2N)
    edge_weight = jax.random.uniform(k_w, (2 * NUM_NODES,), jnp.float32,
                                     minval=0.5, maxval=1.5)
    prev_hidden_state = jax.random.normal(k_h, (NUM_NODES, FILTERS), jnp.float32)

    # Whole-sequence fused kernel (recurrence inside the kernel).
    y_seq, h_final = tgcn_forward_sequence(
        params, x_seq, edge_index, edge_weight, prev_hidden_state,
        num_nodes=NUM_NODES, filters=FILTERS)
    jax.block_until_ready((y_seq, h_final))

    y_exp, h_exp = _reference_sequence(params, x_seq, edge_index, edge_weight,
                                       prev_hidden_state, NUM_NODES, FILTERS)
    assert y_seq.shape == (T, NUM_NODES, 1) and h_final.shape == (NUM_NODES, FILTERS)
    # bf16 MXU operands (A_hat, Xc, H-path) vs. full-f32 reference -> loose tol.
    assert jnp.allclose(y_seq, y_exp, atol=5e-2, rtol=5e-2)
    assert jnp.allclose(h_final, h_exp, atol=5e-2, rtol=5e-2)

    # Single-step API: exactly TGCN_RecurrentGCN.forward.
    y1, h1 = tgcn_forward(params, x_seq[0], edge_index, edge_weight,
                          prev_hidden_state, num_nodes=NUM_NODES, filters=FILTERS)
    jax.block_until_ready((y1, h1))
    y1_exp, h1_exp = _reference_sequence(params, x_seq[:1], edge_index,
                                         edge_weight, prev_hidden_state,
                                         NUM_NODES, FILTERS)
    assert jnp.allclose(y1, y1_exp[0], atol=5e-2, rtol=5e-2)
    assert jnp.allclose(h1, h1_exp, atol=5e-2, rtol=5e-2)

    # TODO(synk): the module's accumulated_iter_third() bookkeeping (self.iter /
    # num_model) is training-loop state with no forward-pass effect; not ported.

    print("KERNEL_OK")
</pallas_src>

<mosaic_0001>
module attributes {stable_mosaic.version = 11 : i64} {
  func.func private @main(%arg0: i32) attributes {dimension_semantics = [#tpu.dimension_semantics<core_parallel>], iteration_bounds = array<i64: 2>, tpu.core_type = #tpu.core_type<sc_scalar_subcore>, window_params = []} {
    return
  }
}

module attributes {stable_mosaic.version = 11 : i64} {
  func.func private @main(%arg0: i32) attributes {dimension_semantics = [#tpu.dimension_semantics<core_parallel>], iteration_bounds = array<i64: 2>, tpu.core_type = #tpu.core_type<sc_scalar_subcore>, window_params = []} {
    return
  }
}

module attributes {stable_mosaic.version = 11 : i64} {
  func.func @kernel(%arg0: i32, %arg1: i32, %arg2: memref<16x16xbf16, #tpu.memory_space<vmem>>, %arg3: memref<1x16x1024xbf16, #tpu.memory_space<vmem>>, %arg4: memref<16x32xf32, #tpu.memory_space<vmem>>, %arg5: memref<1x1024xf32, #tpu.memory_space<vmem>>, %arg6: memref<32x64xbf16, #tpu.memory_space<vmem>>, %arg7: memref<32x32xbf16, #tpu.memory_space<vmem>>, %arg8: memref<1x32xf32, #tpu.memory_space<vmem>>, %arg9: memref<1x1xf32, #tpu.memory_space<vmem>>, %arg10: memref<1x16x8xf32, #tpu.memory_space<vmem>>, %arg11: memref<16x32xf32, #tpu.memory_space<vmem>>) attributes {dimension_semantics = [#tpu.dimension_semantics<parallel>, #tpu.dimension_semantics<arbitrary>], iteration_bounds = array<i64: 1, 1>, scalar_prefetch = 0 : i64, scratch_operands = 0 : i64, tpu.core_type = #tpu.core_type<tc>, window_params = [{transform_indices = @transform_0, window_bounds = array<i64: 16, 16>}, {transform_indices = @transform_1, window_bounds = array<i64: 1, 16, 1024>}, {transform_indices = @transform_2, window_bounds = array<i64: 16, 32>}, {pipeline_mode = #tpu.pipeline_mode<synchronous>, transform_indices = @transform_3, window_bounds = array<i64: 1, 1024>}, {pipeline_mode = #tpu.pipeline_mode<synchronous>, transform_indices = @transform_4, window_bounds = array<i64: 32, 64>}, {pipeline_mode = #tpu.pipeline_mode<synchronous>, transform_indices = @transform_5, window_bounds = array<i64: 32, 32>}, {pipeline_mode = #tpu.pipeline_mode<synchronous>, transform_indices = @transform_6, window_bounds = array<i64: 1, 32>}, {pipeline_mode = #tpu.pipeline_mode<synchronous>, transform_indices = @transform_7, window_bounds = array<i64: 1, 1>}, {transform_indices = @transform_8, window_bounds = array<i64: 1, 16, 8>}, {transform_indices = @transform_9, window_bounds = array<i64: 16, 32>}]} {
    %c0_i32 = arith.constant 0 : i32
    %0 = arith.cmpi eq, %arg1, %c0_i32 : i32
    %1 = arith.extui %0 : i1 to i32
    %c0_i32_0 = arith.constant 0 : i32
    %2 = arith.cmpi ne, %1, %c0_i32_0 : i32
    scf.if %2 {
      %c0_108 = arith.constant 0 : index
      %c0_109 = arith.constant 0 : index
      %371 = vector.load %arg4[%c0_108, %c0_109] : memref<16x32xf32, #tpu.memory_space<vmem>>, vector<16x32xf32>
      %c0_110 = arith.constant 0 : index
      %c0_111 = arith.constant 0 : index
      %372 = vector.load %arg11[%c0_110, %c0_111] : memref<16x32xf32, #tpu.memory_space<vmem>>, vector<16x32xf32>
      tpu.vector_store %arg11[%c0_110, %c0_111], %371 {strides = array<i32>} : memref<16x32xf32, #tpu.memory_space<vmem>>, vector<16x32xf32>,
    } else {
    }
    %c0 = arith.constant 0 : index
    %c0_1 = arith.constant 0 : index
    %3 = vector.load %arg11[%c0, %c0_1] : memref<16x32xf32, #tpu.memory_space<vmem>>, vector<16x32xf32>
    %c0_2 = arith.constant 0 : index
    %c0_3 = arith.constant 0 : index
    %4 = vector.load %arg2[%c0_2, %c0_3] : memref<16x16xbf16, #tpu.memory_space<vmem>>, vector<16x16xbf16>
    %c0_4 = arith.constant 0 : index
    %c0_5 = arith.constant 0 : index
    %c0_6 = arith.constant 0 : index
    %5 = vector.load %arg3[%c0_4, %c0_5, %c0_6] : memref<1x16x1024xbf16, #tpu.memory_space<vmem>>, vector<1x16x1024xbf16>
    %6 = vector.shape_cast %5 : vector<1x16x1024xbf16> to vector<16x1024xbf16>
    %cst = arith.constant dense<0.000000e+00> : vector<16x1024xf32>
    %7 = tpu.matmul %4, %6, %cst {dimension_numbers = #tpu.dot_dimension_numbers<[1], [0], [0], [1], [0, 0, 1, 1], [], []>} : vector<16x16xbf16>, vector<16x1024xbf16>, vector<16x1024xf32> -> vector<16x1024xf32>
    %c0_7 = arith.constant 0 : index
    %c0_8 = arith.constant 0 : index
    %8 = vector.load %arg5[%c0_7, %c0_8] : memref<1x1024xf32, #tpu.memory_space<vmem>>, vector<1x1024xf32>
    %9 = vector.broadcast %8 : vector<1x1024xf32> to vector<16x1024xf32>
    %10 = arith.addf %7, %9 : vector<16x1024xf32>
    %11 = tpu.iota {dimensions = array<i32: 1>} : vector<16x8xi32>
    %cst_9 = arith.constant 0.000000e+00 : f32
    %12 = vector.broadcast %cst_9 : f32 to vector<16x8xf32>
    %c0_10 = arith.constant 0 : index
    %c0_11 = arith.constant 0 : index
    %13 = vector.load %arg8[%c0_10, %c0_11] : memref<1x32xf32, #tpu.memory_space<vmem>>, vector<1x32xf32>
    %c0_12 = arith.constant 0 : index
    %c0_13 = arith.constant 0 : index
    %14 = vector.load %arg9[%c0_12, %c0_13] : memref<1x1xf32, #tpu.memory_space<vmem>>, vector<1x1xf32>
    %15 = vector.extract_strided_slice %10 {offsets = [0, 0], sizes = [16, 32], strides = [1, 1]} : vector<16x1024xf32> to vector<16x32xf32>
    %16 = vector.extract_strided_slice %10 {offsets = [0, 32], sizes = [16, 32], strides = [1, 1]} : vector<16x1024xf32> to vector<16x32xf32>
    %17 = vector.extract_strided_slice %10 {offsets = [0, 64], sizes = [16, 32], strides = [1, 1]} : vector<16x1024xf32> to vector<16x32xf32>
    %18 = arith.truncf %3 : vector<16x32xf32> to vector<16x32xbf16>
    %c0_14 = arith.constant 0 : index
    %c0_15 = arith.constant 0 : index
    %19 = vector.load %arg6[%c0_14, %c0_15] : memref<32x64xbf16, #tpu.memory_space<vmem>>, vector<32x64xbf16>
    %cst_16 = arith.constant dense<0.000000e+00> : vector<16x64xf32>
    %20 = tpu.matmul %18, %19, %cst_16 {dimension_numbers = #tpu.dot_dimension_numbers<[1], [0], [0], [1], [0, 0, 1, 1], [], []>} : vector<16x32xbf16>, vector<32x64xbf16>, vector<16x64xf32> -> vector<16x64xf32>
    %21 = vector.extract_strided_slice %20 {offsets = [0, 0], sizes = [16, 32], strides = [1, 1]} : vector<16x64xf32> to vector<16x32xf32>
    %22 = arith.addf %15, %21 : vector<16x32xf32>
    %23 = arith.negf %22 : vector<16x32xf32>
    %24 = math.exp %23 : vector<16x32xf32>
    %cst_17 = arith.constant 1.000000e+00 : f32
    %25 = vector.broadcast %cst_17 : f32 to vector<16x32xf32>
    %26 = arith.addf %25, %24 : vector<16x32xf32>
    %27 = arith.divf %25, %26 : vector<16x32xf32>
    %28 = vector.extract_strided_slice %20 {offsets = [0, 32], sizes = [16, 32], strides = [1, 1]} : vector<16x64xf32> to vector<16x32xf32>
    %29 = arith.addf %16, %28 : vector<16x32xf32>
    %30 = arith.negf %29 : vector<16x32xf32>
    %31 = math.exp %30 : vector<16x32xf32>
    %cst_18 = arith.constant 1.000000e+00 : f32
    %32 = vector.broadcast %cst_18 : f32 to vector<16x32xf32>
    %33 = arith.addf %32, %31 : vector<16x32xf32>
    %34 = arith.divf %32, %33 : vector<16x32xf32>
    %35 = arith.mulf %3, %34 : vector<16x32xf32>
    %36 = arith.truncf %35 : vector<16x32xf32> to vector<16x32xbf16>
    %c0_19 = arith.constant 0 : index
    %c0_20 = arith.constant 0 : index
    %37 = vector.load %arg7[%c0_19, %c0_20] : memref<32x32xbf16, #tpu.memory_space<vmem>>, vector<32x32xbf16>
    %cst_21 = arith.constant dense<0.000000e+00> : vector<16x32xf32>
    %38 = tpu.matmul %36, %37, %cst_21 {dimension_numbers = #tpu.dot_dimension_numbers<[1], [0], [0], [1], [0, 0, 1, 1], [], []>} : vector<16x32xbf16>, vector<32x32xbf16>, vector<16x32xf32> -> vector<16x32xf32>
    %39 = arith.addf %17, %38 : vector<16x32xf32>
    %40 = math.tanh %39 : vector<16x32xf32>
    %41 = arith.mulf %27, %3 : vector<16x32xf32>
    %cst_22 = arith.constant 1.000000e+00 : f32
    %42 = vector.broadcast %cst_22 : f32 to vector<16x32xf32>
    %43 = arith.subf %42, %27 : vector<16x32xf32>
    %44 = arith.mulf %43, %40 : vector<16x32xf32>
    %45 = arith.addf %41, %44 : vector<16x32xf32>
    %cst_23 = arith.constant 0.000000e+00 : f32
    %46 = vector.broadcast %cst_23 : f32 to vector<16x32xf32>
    %47 = arith.maximumf %45, %46 : vector<16x32xf32>
    %48 = vector.broadcast %13 : vector<1x32xf32> to vector<16x32xf32>
    %49 = arith.mulf %47, %48 : vector<16x32xf32>
    %cst_24 = arith.constant dense<0.000000e+00> : vector<16xf32>
    %50 = vector.multi_reduction <add>, %49, %cst_24 [1] : vector<16x32xf32> to vector<16xf32>
    %51 = vector.shape_cast %50 : vector<16xf32> to vector<16x1xf32>
    %52 = vector.broadcast %14 : vector<1x1xf32> to vector<16x1xf32>
    %53 = arith.addf %51, %52 : vector<16x1xf32>
    %c0_i32_25 = arith.constant 0 : i32
    %54 = vector.broadcast %c0_i32_25 : i32 to vector<16x8xi32>
    %55 = arith.cmpi eq, %11, %54 : vector<16x8xi32>
    %56 = vector.shape_cast %53 : vector<16x1xf32> to vector<16x1xf32>
    %57 = vector.broadcast %56 : vector<16x1xf32> to vector<16x8xf32>
    %58 = arith.select %55, %57, %12 : vector<16x8xi1>, vector<16x8xf32>
    %59 = vector.extract_strided_slice %10 {offsets = [0, 128], sizes = [16, 32], strides = [1, 1]} : vector<16x1024xf32> to vector<16x32xf32>
    %60 = vector.extract_strided_slice %10 {offsets = [0, 160], sizes = [16, 32], strides = [1, 1]} : vector<16x1024xf32> to vector<16x32xf32>
    %61 = vector.extract_strided_slice %10 {offsets = [0, 192], sizes = [16, 32], strides = [1, 1]} : vector<16x1024xf32> to vector<16x32xf32>
    %62 = arith.truncf %45 : vector<16x32xf32> to vector<16x32xbf16>
    %c0_26 = arith.constant 0 : index
    %c0_27 = arith.constant 0 : index
    %63 = vector.load %arg6[%c0_26, %c0_27] : memref<32x64xbf16, #tpu.memory_space<vmem>>, vector<32x64xbf16>
    %cst_28 = arith.constant dense<0.000000e+00> : vector<16x64xf32>
    %64 = tpu.matmul %62, %63, %cst_28 {dimension_numbers = #tpu.dot_dimension_numbers<[1], [0], [0], [1], [0, 0, 1, 1], [], []>} : vector<16x32xbf16>, vector<32x64xbf16>, vector<16x64xf32> -> vector<16x64xf32>
    %65 = vector.extract_strided_slice %64 {offsets = [0, 0], sizes = [16, 32], strides = [1, 1]} : vector<16x64xf32> to vector<16x32xf32>
    %66 = arith.addf %59, %65 : vector<16x32xf32>
    %67 = arith.negf %66 : vector<16x32xf32>
    %68 = math.exp %67 : vector<16x32xf32>
    %cst_29 = arith.constant 1.000000e+00 : f32
    %69 = vector.broadcast %cst_29 : f32 to vector<16x32xf32>
    %70 = arith.addf %69, %68 : vector<16x32xf32>
    %71 = arith.divf %69, %70 : vector<16x32xf32>
    %72 = vector.extract_strided_slice %64 {offsets = [0, 32], sizes = [16, 32], strides = [1, 1]} : vector<16x64xf32> to vector<16x32xf32>
    %73 = arith.addf %60, %72 : vector<16x32xf32>
    %74 = arith.negf %73 : vector<16x32xf32>
    %75 = math.exp %74 : vector<16x32xf32>
    %cst_30 = arith.constant 1.000000e+00 : f32
    %76 = vector.broadcast %cst_30 : f32 to vector<16x32xf32>
    %77 = arith.addf %76, %75 : vector<16x32xf32>
    %78 = arith.divf %76, %77 : vector<16x32xf32>
    %79 = arith.mulf %45, %78 : vector<16x32xf32>
    %80 = arith.truncf %79 : vector<16x32xf32> to vector<16x32xbf16>
    %c0_31 = arith.constant 0 : index
    %c0_32 = arith.constant 0 : index
    %81 = vector.load %arg7[%c0_31, %c0_32] : memref<32x32xbf16, #tpu.memory_space<vmem>>, vector<32x32xbf16>
    %cst_33 = arith.constant dense<0.000000e+00> : vector<16x32xf32>
    %82 = tpu.matmul %80, %81, %cst_33 {dimension_numbers = #tpu.dot_dimension_numbers<[1], [0], [0], [1], [0, 0, 1, 1], [], []>} : vector<16x32xbf16>, vector<32x32xbf16>, vector<16x32xf32> -> vector<16x32xf32>
    %83 = arith.addf %61, %82 : vector<16x32xf32>
    %84 = math.tanh %83 : vector<16x32xf32>
    %85 = arith.mulf %71, %45 : vector<16x32xf32>
    %cst_34 = arith.constant 1.000000e+00 : f32
    %86 = vector.broadcast %cst_34 : f32 to vector<16x32xf32>
    %87 = arith.subf %86, %71 : vector<16x32xf32>
    %88 = arith.mulf %87, %84 : vector<16x32xf32>
    %89 = arith.addf %85, %88 : vector<16x32xf32>
    %cst_35 = arith.constant 0.000000e+00 : f32
    %90 = vector.broadcast %cst_35 : f32 to vector<16x32xf32>
    %91 = arith.maximumf %89, %90 : vector<16x32xf32>
    %92 = vector.broadcast %13 : vector<1x32xf32> to vector<16x32xf32>
    %93 = arith.mulf %91, %92 : vector<16x32xf32>
    %cst_36 = arith.constant dense<0.000000e+00> : vector<16xf32>
    %94 = vector.multi_reduction <add>, %93, %cst_36 [1] : vector<16x32xf32> to vector<16xf32>
    %95 = vector.shape_cast %94 : vector<16xf32> to vector<16x1xf32>
    %96 = vector.broadcast %14 : vector<1x1xf32> to vector<16x1xf32>
    %97 = arith.addf %95, %96 : vector<16x1xf32>
    %c1_i32 = arith.constant 1 : i32
    %98 = vector.broadcast %c1_i32 : i32 to vector<16x8xi32>
    %99 = arith.cmpi eq, %11, %98 : vector<16x8xi32>
    %100 = vector.shape_cast %97 : vector<16x1xf32> to vector<16x1xf32>
    %101 = vector.broadcast %100 : vector<16x1xf32> to vector<16x8xf32>
    %102 = arith.select %99, %101, %58 : vector<16x8xi1>, vector<16x8xf32>
    %103 = vector.extract_strided_slice %10 {offsets = [0, 256], sizes = [16, 32], strides = [1, 1]} : vector<16x1024xf32> to vector<16x32xf32>
    %104 = vector.extract_strided_slice %10 {offsets = [0, 288], sizes = [16, 32], strides = [1, 1]} : vector<16x1024xf32> to vector<16x32xf32>
    %105 = vector.extract_strided_slice %10 {offsets = [0, 320], sizes = [16, 32], strides = [1, 1]} : vector<16x1024xf32> to vector<16x32xf32>
    %106 = arith.truncf %89 : vector<16x32xf32> to vector<16x32xbf16>
    %c0_37 = arith.constant 0 : index
    %c0_38 = arith.constant 0 : index
    %107 = vector.load %arg6[%c0_37, %c0_38] : memref<32x64xbf16, #tpu.memory_space<vmem>>, vector<32x64xbf16>
    %cst_39 = arith.constant dense<0.000000e+00> : vector<16x64xf32>
    %108 = tpu.matmul %106, %107, %cst_39 {dimension_numbers = #tpu.dot_dimension_numbers<[1], [0], [0], [1], [0, 0, 1, 1], [], []>} : vector<16x32xbf16>, vector<32x64xbf16>, vector<16x64xf32> -> vector<16x64xf32>
    %109 = vector.extract_strided_slice %108 {offsets = [0, 0], sizes = [16, 32], strides = [1, 1]} : vector<16x64xf32> to vector<16x32xf32>
    %110 = arith.addf %103, %109 : vector<16x32xf32>
    %111 = arith.negf %110 : vector<16x32xf32>
    %112 = math.exp %111 : vector<16x32xf32>
    %cst_40 = arith.constant 1.000000e+00 : f32
    %113 = vector.broadcast %cst_40 : f32 to vector<16x32xf32>
    %114 = arith.addf %113, %112 : vector<16x32xf32>
    %115 = arith.divf %113, %114 : vector<16x32xf32>
    %116 = vector.extract_strided_slice %108 {offsets = [0, 32], sizes = [16, 32], strides = [1, 1]} : vector<16x64xf32> to vector<16x32xf32>
    %117 = arith.addf %104, %116 : vector<16x32xf32>
    %118 = arith.negf %117 : vector<16x32xf32>
    %119 = math.exp %118 : vector<16x32xf32>
    %cst_41 = arith.constant 1.000000e+00 : f32
    %120 = vector.broadcast %cst_41 : f32 to vector<16x32xf32>
    %121 = arith.addf %120, %119 : vector<16x32xf32>
    %122 = arith.divf %120, %121 : vector<16x32xf32>
    %123 = arith.mulf %89, %122 : vector<16x32xf32>
    %124 = arith.truncf %123 : vector<16x32xf32> to vector<16x32xbf16>
    %c0_42 = arith.constant 0 : index
    %c0_43 = arith.constant 0 : index
    %125 = vector.load %arg7[%c0_42, %c0_43] : memref<32x32xbf16, #tpu.memory_space<vmem>>, vector<32x32xbf16>
    %cst_44 = arith.constant dense<0.000000e+00> : vector<16x32xf32>
    %126 = tpu.matmul %124, %125, %cst_44 {dimension_numbers = #tpu.dot_dimension_numbers<[1], [0], [0], [1], [0, 0, 1, 1], [], []>} : vector<16x32xbf16>, vector<32x32xbf16>, vector<16x32xf32> -> vector<16x32xf32>
    %127 = arith.addf %105, %126 : vector<16x32xf32>
    %128 = math.tanh %127 : vector<16x32xf32>
    %129 = arith.mulf %115, %89 : vector<16x32xf32>
    %cst_45 = arith.constant 1.000000e+00 : f32
    %130 = vector.broadcast %cst_45 : f32 to vector<16x32xf32>
    %131 = arith.subf %130, %115 : vector<16x32xf32>
    %132 = arith.mulf %131, %128 : vector<16x32xf32>
    %133 = arith.addf %129, %132 : vector<16x32xf32>
    %cst_46 = arith.constant 0.000000e+00 : f32
    %134 = vector.broadcast %cst_46 : f32 to vector<16x32xf32>
    %135 = arith.maximumf %133, %134 : vector<16x32xf32>
    %136 = vector.broadcast %13 : vector<1x32xf32> to vector<16x32xf32>
    %137 = arith.mulf %135, %136 : vector<16x32xf32>
    %cst_47 = arith.constant dense<0.000000e+00> : vector<16xf32>
    %138 = vector.multi_reduction <add>, %137, %cst_47 [1] : vector<16x32xf32> to vector<16xf32>
    %139 = vector.shape_cast %138 : vector<16xf32> to vector<16x1xf32>
    %140 = vector.broadcast %14 : vector<1x1xf32> to vector<16x1xf32>
    %141 = arith.addf %139, %140 : vector<16x1xf32>
    %c2_i32 = arith.constant 2 : i32
    %142 = vector.broadcast %c2_i32 : i32 to vector<16x8xi32>
    %143 = arith.cmpi eq, %11, %142 : vector<16x8xi32>
    %144 = vector.shape_cast %141 : vector<16x1xf32> to vector<16x1xf32>
    %145 = vector.broadcast %144 : vector<16x1xf32> to vector<16x8xf32>
    %146 = arith.select %143, %145, %102 : vector<16x8xi1>, vector<16x8xf32>
    %147 = vector.extract_strided_slice %10 {offsets = [0, 384], sizes = [16, 32], strides = [1, 1]} : vector<16x1024xf32> to vector<16x32xf32>
    %148 = vector.extract_strided_slice %10 {offsets = [0, 416], sizes = [16, 32], strides = [1, 1]} : vector<16x1024xf32> to vector<16x32xf32>
    %149 = vector.extract_strided_slice %10 {offsets = [0, 448], sizes = [16, 32], strides = [1, 1]} : vector<16x1024xf32> to vector<16x32xf32>
    %150 = arith.truncf %133 : vector<16x32xf32> to vector<16x32xbf16>
    %c0_48 = arith.constant 0 : index
    %c0_49 = arith.constant 0 : index
    %151 = vector.load %arg6[%c0_48, %c0_49] : memref<32x64xbf16, #tpu.memory_space<vmem>>, vector<32x64xbf16>
    %cst_50 = arith.constant dense<0.000000e+00> : vector<16x64xf32>
    %152 = tpu.matmul %150, %151, %cst_50 {dimension_numbers = #tpu.dot_dimension_numbers<[1], [0], [0], [1], [0, 0, 1, 1], [], []>} : vector<16x32xbf16>, vector<32x64xbf16>, vector<16x64xf32> -> vector<16x64xf32>
    %153 = vector.extract_strided_slice %152 {offsets = [0, 0], sizes = [16, 32], strides = [1, 1]} : vector<16x64xf32> to vector<16x32xf32>
    %154 = arith.addf %147, %153 : vector<16x32xf32>
    %155 = arith.negf %154 : vector<16x32xf32>
    %156 = math.exp %155 : vector<16x32xf32>
    %cst_51 = arith.constant 1.000000e+00 : f32
    %157 = vector.broadcast %cst_51 : f32 to vector<16x32xf32>
    %158 = arith.addf %157, %156 : vector<16x32xf32>
    %159 = arith.divf %157, %158 : vector<16x32xf32>
    %160 = vector.extract_strided_slice %152 {offsets = [0, 32], sizes = [16, 32], strides = [1, 1]} : vector<16x64xf32> to vector<16x32xf32>
    %161 = arith.addf %148, %160 : vector<16x32xf32>
    %162 = arith.negf %161 : vector<16x32xf32>
    %163 = math.exp %162 : vector<16x32xf32>
    %cst_52 = arith.constant 1.000000e+00 : f32
    %164 = vector.broadcast %cst_52 : f32 to vector<16x32xf32>
    %165 = arith.addf %164, %163 : vector<16x32xf32>
    %166 = arith.divf %164, %165 : vector<16x32xf32>
    %167 = arith.mulf %133, %166 : vector<16x32xf32>
    %168 = arith.truncf %167 : vector<16x32xf32> to vector<16x32xbf16>
    %c0_53 = arith.constant 0 : index
    %c0_54 = arith.constant 0 : index
    %169 = vector.load %arg7[%c0_53, %c0_54] : memref<32x32xbf16, #tpu.memory_space<vmem>>, vector<32x32xbf16>
    %cst_55 = arith.constant dense<0.000000e+00> : vector<16x32xf32>
    %170 = tpu.matmul %168, %169, %cst_55 {dimension_numbers = #tpu.dot_dimension_numbers<[1], [0], [0], [1], [0, 0, 1, 1], [], []>} : vector<16x32xbf16>, vector<32x32xbf16>, vector<16x32xf32> -> vector<16x32xf32>
    %171 = arith.addf %149, %170 : vector<16x32xf32>
    %172 = math.tanh %171 : vector<16x32xf32>
    %173 = arith.mulf %159, %133 : vector<16x32xf32>
    %cst_56 = arith.constant 1.000000e+00 : f32
    %174 = vector.broadcast %cst_56 : f32 to vector<16x32xf32>
    %175 = arith.subf %174, %159 : vector<16x32xf32>
    %176 = arith.mulf %175, %172 : vector<16x32xf32>
    %177 = arith.addf %173, %176 : vector<16x32xf32>
    %cst_57 = arith.constant 0.000000e+00 : f32
    %178 = vector.broadcast %cst_57 : f32 to vector<16x32xf32>
    %179 = arith.maximumf %177, %178 : vector<16x32xf32>
    %180 = vector.broadcast %13 : vector<1x32xf32> to vector<16x32xf32>
    %181 = arith.mulf %179, %180 : vector<16x32xf32>
    %cst_58 = arith.constant dense<0.000000e+00> : vector<16xf32>
    %182 = vector.multi_reduction <add>, %181, %cst_58 [1] : vector<16x32xf32> to vector<16xf32>
    %183 = vector.shape_cast %182 : vector<16xf32> to vector<16x1xf32>
    %184 = vector.broadcast %14 : vector<1x1xf32> to vector<16x1xf32>
    %185 = arith.addf %183, %184 : vector<16x1xf32>
    %c3_i32 = arith.constant 3 : i32
    %186 = vector.broadcast %c3_i32 : i32 to vector<16x8xi32>
    %187 = arith.cmpi eq, %11, %186 : vector<16x8xi32>
    %188 = vector.shape_cast %185 : vector<16x1xf32> to vector<16x1xf32>
    %189 = vector.broadcast %188 : vector<16x1xf32> to vector<16x8xf32>
    %190 = arith.select %187, %189, %146 : vector<16x8xi1>, vector<16x8xf32>
    %191 = vector.extract_strided_slice %10 {offsets = [0, 512], sizes = [16, 32], strides = [1, 1]} : vector<16x1024xf32> to vector<16x32xf32>
    %192 = vector.extract_strided_slice %10 {offsets = [0, 544], sizes = [16, 32], strides = [1, 1]} : vector<16x1024xf32> to vector<16x32xf32>
    %193 = vector.extract_strided_slice %10 {offsets = [0, 576], sizes = [16, 32], strides = [1, 1]} : vector<16x1024xf32> to vector<16x32xf32>
    %194 = arith.truncf %177 : vector<16x32xf32> to vector<16x32xbf16>
    %c0_59 = arith.constant 0 : index
    %c0_60 = arith.constant 0 : index
    %195 = vector.load %arg6[%c0_59, %c0_60] : memref<32x64xbf16, #tpu.memory_space<vmem>>, vector<32x64xbf16>
    %cst_61 = arith.constant dense<0.000000e+00> : vector<16x64xf32>
    %196 = tpu.matmul %194, %195, %cst_61 {dimension_numbers = #tpu.dot_dimension_numbers<[1], [0], [0], [1], [0, 0, 1, 1], [], []>} : vector<16x32xbf16>, vector<32x64xbf16>, vector<16x64xf32> -> vector<16x64xf32>
    %197 = vector.extract_strided_slice %196 {offsets = [0, 0], sizes = [16, 32], strides = [1, 1]} : vector<16x64xf32> to vector<16x32xf32>
    %198 = arith.addf %191, %197 : vector<16x32xf32>
    %199 = arith.negf %198 : vector<16x32xf32>
    %200 = math.exp %199 : vector<16x32xf32>
    %cst_62 = arith.constant 1.000000e+00 : f32
    %201 = vector.broadcast %cst_62 : f32 to vector<16x32xf32>
    %202 = arith.addf %201, %200 : vector<16x32xf32>
    %203 = arith.divf %201, %202 : vector<16x32xf32>
    %204 = vector.extract_strided_slice %196 {offsets = [0, 32], sizes = [16, 32], strides = [1, 1]} : vector<16x64xf32> to vector<16x32xf32>
    %205 = arith.addf %192, %204 : vector<16x32xf32>
    %206 = arith.negf %205 : vector<16x32xf32>
    %207 = math.exp %206 : vector<16x32xf32>
    %cst_63 = arith.constant 1.000000e+00 : f32
    %208 = vector.broadcast %cst_63 : f32 to vector<16x32xf32>
    %209 = arith.addf %208, %207 : vector<16x32xf32>
    %210 = arith.divf %208, %209 : vector<16x32xf32>
    %211 = arith.mulf %177, %210 : vector<16x32xf32>
    %212 = arith.truncf %211 : vector<16x32xf32> to vector<16x32xbf16>
    %c0_64 = arith.constant 0 : index
    %c0_65 = arith.constant 0 : index
    %213 = vector.load %arg7[%c0_64, %c0_65] : memref<32x32xbf16, #tpu.memory_space<vmem>>, vector<32x32xbf16>
    %cst_66 = arith.constant dense<0.000000e+00> : vector<16x32xf32>
    %214 = tpu.matmul %212, %213, %cst_66 {dimension_numbers = #tpu.dot_dimension_numbers<[1], [0], [0], [1], [0, 0, 1, 1], [], []>} : vector<16x32xbf16>, vector<32x32xbf16>, vector<16x32xf32> -> vector<16x32xf32>
    %215 = arith.addf %193, %214 : vector<16x32xf32>
    %216 = math.tanh %215 : vector<16x32xf32>
    %217 = arith.mulf %203, %177 : vector<16x32xf32>
    %cst_67 = arith.constant 1.000000e+00 : f32
    %218 = vector.broadcast %cst_67 : f32 to vector<16x32xf32>
    %219 = arith.subf %218, %203 : vector<16x32xf32>
    %220 = arith.mulf %219, %216 : vector<16x32xf32>
    %221 = arith.addf %217, %220 : vector<16x32xf32>
    %cst_68 = arith.constant 0.000000e+00 : f32
    %222 = vector.broadcast %cst_68 : f32 to vector<16x32xf32>
    %223 = arith.maximumf %221, %222 : vector<16x32xf32>
    %224 = vector.broadcast %13 : vector<1x32xf32> to vector<16x32xf32>
    %225 = arith.mulf %223, %224 : vector<16x32xf32>
    %cst_69 = arith.constant dense<0.000000e+00> : vector<16xf32>
    %226 = vector.multi_reduction <add>, %225, %cst_69 [1] : vector<16x32xf32> to vector<16xf32>
    %227 = vector.shape_cast %226 : vector<16xf32> to vector<16x1xf32>
    %228 = vector.broadcast %14 : vector<1x1xf32> to vector<16x1xf32>
    %229 = arith.addf %227, %228 : vector<16x1xf32>
    %c4_i32 = arith.constant 4 : i32
    %230 = vector.broadcast %c4_i32 : i32 to vector<16x8xi32>
    %231 = arith.cmpi eq, %11, %230 : vector<16x8xi32>
    %232 = vector.shape_cast %229 : vector<16x1xf32> to vector<16x1xf32>
    %233 = vector.broadcast %232 : vector<16x1xf32> to vector<16x8xf32>
    %234 = arith.select %231, %233, %190 : vector<16x8xi1>, vector<16x8xf32>
    %235 = vector.extract_strided_slice %10 {offsets = [0, 640], sizes = [16, 32], strides = [1, 1]} : vector<16x1024xf32> to vector<16x32xf32>
    %236 = vector.extract_strided_slice %10 {offsets = [0, 672], sizes = [16, 32], strides = [1, 1]} : vector<16x1024xf32> to vector<16x32xf32>
    %237 = vector.extract_strided_slice %10 {offsets = [0, 704], sizes = [16, 32], strides = [1, 1]} : vector<16x1024xf32> to vector<16x32xf32>
    %238 = arith.truncf %221 : vector<16x32xf32> to vector<16x32xbf16>
    %c0_70 = arith.constant 0 : index
    %c0_71 = arith.constant 0 : index
    %239 = vector.load %arg6[%c0_70, %c0_71] : memref<32x64xbf16, #tpu.memory_space<vmem>>, vector<32x64xbf16>
    %cst_72 = arith.constant dense<0.000000e+00> : vector<16x64xf32>
    %240 = tpu.matmul %238, %239, %cst_72 {dimension_numbers = #tpu.dot_dimension_numbers<[1], [0], [0], [1], [0, 0, 1, 1], [], []>} : vector<16x32xbf16>, vector<32x64xbf16>, vector<16x64xf32> -> vector<16x64xf32>
    %241 = vector.extract_strided_slice %240 {offsets = [0, 0], sizes = [16, 32], strides = [1, 1]} : vector<16x64xf32> to vector<16x32xf32>
    %242 = arith.addf %235, %241 : vector<16x32xf32>
    %243 = arith.negf %242 : vector<16x32xf32>
    %244 = math.exp %243 : vector<16x32xf32>
    %cst_73 = arith.constant 1.000000e+00 : f32
    %245 = vector.broadcast %cst_73 : f32 to vector<16x32xf32>
    %246 = arith.addf %245, %244 : vector<16x32xf32>
    %247 = arith.divf %245, %246 : vector<16x32xf32>
    %248 = vector.extract_strided_slice %240 {offsets = [0, 32], sizes = [16, 32], strides = [1, 1]} : vector<16x64xf32> to vector<16x32xf32>
    %249 = arith.addf %236, %248 : vector<16x32xf32>
    %250 = arith.negf %249 : vector<16x32xf32>
    %251 = math.exp %250 : vector<16x32xf32>
    %cst_74 = arith.constant 1.000000e+00 : f32
    %252 = vector.broadcast %cst_74 : f32 to vector<16x32xf32>
    %253 = arith.addf %252, %251 : vector<16x32xf32>
    %254 = arith.divf %252, %253 : vector<16x32xf32>
    %255 = arith.mulf %221, %254 : vector<16x32xf32>
    %256 = arith.truncf %255 : vector<16x32xf32> to vector<16x32xbf16>
    %c0_75 = arith.constant 0 : index
    %c0_76 = arith.constant 0 : index
    %257 = vector.load %arg7[%c0_75, %c0_76] : memref<32x32xbf16, #tpu.memory_space<vmem>>, vector<32x32xbf16>
    %cst_77 = arith.constant dense<0.000000e+00> : vector<16x32xf32>
    %258 = tpu.matmul %256, %257, %cst_77 {dimension_numbers = #tpu.dot_dimension_numbers<[1], [0], [0], [1], [0, 0, 1, 1], [], []>} : vector<16x32xbf16>, vector<32x32xbf16>, vector<16x32xf32> -> vector<16x32xf32>
    %259 = arith.addf %237, %258 : vector<16x32xf32>
    %260 = math.tanh %259 : vector<16x32xf32>
    %261 = arith.mulf %247, %221 : vector<16x32xf32>
    %cst_78 = arith.constant 1.000000e+00 : f32
    %262 = vector.broadcast %cst_78 : f32 to vector<16x32xf32>
    %263 = arith.subf %262, %247 : vector<16x32xf32>
    %264 = arith.mulf %263, %260 : vector<16x32xf32>
    %265 = arith.addf %261, %264 : vector<16x32xf32>
    %cst_79 = arith.constant 0.000000e+00 : f32
    %266 = vector.broadcast %cst_79 : f32 to vector<16x32xf32>
    %267 = arith.maximumf %265, %266 : vector<16x32xf32>
    %268 = vector.broadcast %13 : vector<1x32xf32> to vector<16x32xf32>
    %269 = arith.mulf %267, %268 : vector<16x32xf32>
    %cst_80 = arith.constant dense<0.000000e+00> : vector<16xf32>
    %270 = vector.multi_reduction <add>, %269, %cst_80 [1] : vector<16x32xf32> to vector<16xf32>
    %271 = vector.shape_cast %270 : vector<16xf32> to vector<16x1xf32>
    %272 = vector.broadcast %14 : vector<1x1xf32> to vector<16x1xf32>
    %273 = arith.addf %271, %272 : vector<16x1xf32>
    %c5_i32 = arith.constant 5 : i32
    %274 = vector.broadcast %c5_i32 : i32 to vector<16x8xi32>
    %275 = arith.cmpi eq, %11, %274 : vector<16x8xi32>
    %276 = vector.shape_cast %273 : vector<16x1xf32> to vector<16x1xf32>
    %277 = vector.broadcast %276 : vector<16x1xf32> to vector<16x8xf32>
    %278 = arith.select %275, %277, %234 : vector<16x8xi1>, vector<16x8xf32>
    %279 = vector.extract_strided_slice %10 {offsets = [0, 768], sizes = [16, 32], strides = [1, 1]} : vector<16x1024xf32> to vector<16x32xf32>
    %280 = vector.extract_strided_slice %10 {offsets = [0, 800], sizes = [16, 32], strides = [1, 1]} : vector<16x1024xf32> to vector<16x32xf32>
    %281 = vector.extract_strided_slice %10 {offsets = [0, 832], sizes = [16, 32], strides = [1, 1]} : vector<16x1024xf32> to vector<16x32xf32>
    %282 = arith.truncf %265 : vector<16x32xf32> to vector<16x32xbf16>
    %c0_81 = arith.constant 0 : index
    %c0_82 = arith.constant 0 : index
    %283 = vector.load %arg6[%c0_81, %c0_82] : memref<32x64xbf16, #tpu.memory_space<vmem>>, vector<32x64xbf16>
    %cst_83 = arith.constant dense<0.000000e+00> : vector<16x64xf32>
    %284 = tpu.matmul %282, %283, %cst_83 {dimension_numbers = #tpu.dot_dimension_numbers<[1], [0], [0], [1], [0, 0, 1, 1], [], []>} : vector<16x32xbf16>, vector<32x64xbf16>, vector<16x64xf32> -> vector<16x64xf32>
    %285 = vector.extract_strided_slice %284 {offsets = [0, 0], sizes = [16, 32], strides = [1, 1]} : vector<16x64xf32> to vector<16x32xf32>
    %286 = arith.addf %279, %285 : vector<16x32xf32>
    %287 = arith.negf %286 : vector<16x32xf32>
    %288 = math.exp %287 : vector<16x32xf32>
    %cst_84 = arith.constant 1.000000e+00 : f32
    %289 = vector.broadcast %cst_84 : f32 to vector<16x32xf32>
    %290 = arith.addf %289, %288 : vector<16x32xf32>
    %291 = arith.divf %289, %290 : vector<16x32xf32>
    %292 = vector.extract_strided_slice %284 {offsets = [0, 32], sizes = [16, 32], strides = [1, 1]} : vector<16x64xf32> to vector<16x32xf32>
    %293 = arith.addf %280, %292 : vector<16x32xf32>
    %294 = arith.negf %293 : vector<16x32xf32>
    %295 = math.exp %294 : vector<16x32xf32>
    %cst_85 = arith.constant 1.000000e+00 : f32
    %296 = vector.broadcast %cst_85 : f32 to vector<16x32xf32>
    %297 = arith.addf %296, %295 : vector<16x32xf32>
    %298 = arith.divf %296, %297 : vector<16x32xf32>
    %299 = arith.mulf %265, %298 : vector<16x32xf32>
    %300 = arith.truncf %299 : vector<16x32xf32> to vector<16x32xbf16>
    %c0_86 = arith.constant 0 : index
    %c0_87 = arith.constant 0 : index
    %301 = vector.load %arg7[%c0_86, %c0_87] : memref<32x32xbf16, #tpu.memory_space<vmem>>, vector<32x32xbf16>
    %cst_88 = arith.constant dense<0.000000e+00> : vector<16x32xf32>
    %302 = tpu.matmul %300, %301, %cst_88 {dimension_numbers = #tpu.dot_dimension_numbers<[1], [0], [0], [1], [0, 0, 1, 1], [], []>} : vector<16x32xbf16>, vector<32x32xbf16>, vector<16x32xf32> -> vector<16x32xf32>
    %303 = arith.addf %281, %302 : vector<16x32xf32>
    %304 = math.tanh %303 : vector<16x32xf32>
    %305 = arith.mulf %291, %265 : vector<16x32xf32>
    %cst_89 = arith.constant 1.000000e+00 : f32
    %306 = vector.broadcast %cst_89 : f32 to vector<16x32xf32>
    %307 = arith.subf %306, %291 : vector<16x32xf32>
    %308 = arith.mulf %307, %304 : vector<16x32xf32>
    %309 = arith.addf %305, %308 : vector<16x32xf32>
    %cst_90 = arith.constant 0.000000e+00 : f32
    %310 = vector.broadcast %cst_90 : f32 to vector<16x32xf32>
    %311 = arith.maximumf %309, %310 : vector<16x32xf32>
    %312 = vector.broadcast %13 : vector<1x32xf32> to vector<16x32xf32>
    %313 = arith.mulf %311, %312 : vector<16x32xf32>
    %cst_91 = arith.constant dense<0.000000e+00> : vector<16xf32>
    %314 = vector.multi_reduction <add>, %313, %cst_91 [1] : vector<16x32xf32> to vector<16xf32>
    %315 = vector.shape_cast %314 : vector<16xf32> to vector<16x1xf32>
    %316 = vector.broadcast %14 : vector<1x1xf32> to vector<16x1xf32>
    %317 = arith.addf %315, %316 : vector<16x1xf32>
    %c6_i32 = arith.constant 6 : i32
    %318 = vector.broadcast %c6_i32 : i32 to vector<16x8xi32>
    %319 = arith.cmpi eq, %11, %318 : vector<16x8xi32>
    %320 = vector.shape_cast %317 : vector<16x1xf32> to vector<16x1xf32>
    %321 = vector.broadcast %320 : vector<16x1xf32> to vector<16x8xf32>
    %322 = arith.select %319, %321, %278 : vector<16x8xi1>, vector<16x8xf32>
    %323 = vector.extract_strided_slice %10 {offsets = [0, 896], sizes = [16, 32], strides = [1, 1]} : vector<16x1024xf32> to vector<16x32xf32>
    %324 = vector.extract_strided_slice %10 {offsets = [0, 928], sizes = [16, 32], strides = [1, 1]} : vector<16x1024xf32> to vector<16x32xf32>
    %325 = vector.extract_strided_slice %10 {offsets = [0, 960], sizes = [16, 32], strides = [1, 1]} : vector<16x1024xf32> to vector<16x32xf32>
    %326 = arith.truncf %309 : vector<16x32xf32> to vector<16x32xbf16>
    %c0_92 = arith.constant 0 : index
    %c0_93 = arith.constant 0 : index
    %327 = vector.load %arg6[%c0_92, %c0_93] : memref<32x64xbf16, #tpu.memory_space<vmem>>, vector<32x64xbf16>
    %cst_94 = arith.constant dense<0.000000e+00> : vector<16x64xf32>
    %328 = tpu.matmul %326, %327, %cst_94 {dimension_numbers = #tpu.dot_dimension_numbers<[1], [0], [0], [1], [0, 0, 1, 1], [], []>} : vector<16x32xbf16>, vector<32x64xbf16>, vector<16x64xf32> -> vector<16x64xf32>
    %329 = vector.extract_strided_slice %328 {offsets = [0, 0], sizes = [16, 32], strides = [1, 1]} : vector<16x64xf32> to vector<16x32xf32>
    %330 = arith.addf %323, %329 : vector<16x32xf32>
    %331 = arith.negf %330 : vector<16x32xf32>
    %332 = math.exp %331 : vector<16x32xf32>
    %cst_95 = arith.constant 1.000000e+00 : f32
    %333 = vector.broadcast %cst_95 : f32 to vector<16x32xf32>
    %334 = arith.addf %333, %332 : vector<16x32xf32>
    %335 = arith.divf %333, %334 : vector<16x32xf32>
    %336 = vector.extract_strided_slice %328 {offsets = [0, 32], sizes = [16, 32], strides = [1, 1]} : vector<16x64xf32> to vector<16x32xf32>
    %337 = arith.addf %324, %336 : vector<16x32xf32>
    %338 = arith.negf %337 : vector<16x32xf32>
    %339 = math.exp %338 : vector<16x32xf32>
    %cst_96 = arith.constant 1.000000e+00 : f32
    %340 = vector.broadcast %cst_96 : f32 to vector<16x32xf32>
    %341 = arith.addf %340, %339 : vector<16x32xf32>
    %342 = arith.divf %340, %341 : vector<16x32xf32>
    %343 = arith.mulf %309, %342 : vector<16x32xf32>
    %344 = arith.truncf %343 : vector<16x32xf32> to vector<16x32xbf16>
    %c0_97 = arith.constant 0 : index
    %c0_98 = arith.constant 0 : index
    %345 = vector.load %arg7[%c0_97, %c0_98] : memref<32x32xbf16, #tpu.memory_space<vmem>>, vector<32x32xbf16>
    %cst_99 = arith.constant dense<0.000000e+00> : vector<16x32xf32>
    %346 = tpu.matmul %344, %345, %cst_99 {dimension_numbers = #tpu.dot_dimension_numbers<[1], [0], [0], [1], [0, 0, 1, 1], [], []>} : vector<16x32xbf16>, vector<32x32xbf16>, vector<16x32xf32> -> vector<16x32xf32>
    %347 = arith.addf %325, %346 : vector<16x32xf32>
    %348 = math.tanh %347 : vector<16x32xf32>
    %349 = arith.mulf %335, %309 : vector<16x32xf32>
    %cst_100 = arith.constant 1.000000e+00 : f32
    %350 = vector.broadcast %cst_100 : f32 to vector<16x32xf32>
    %351 = arith.subf %350, %335 : vector<16x32xf32>
    %352 = arith.mulf %351, %348 : vector<16x32xf32>
    %353 = arith.addf %349, %352 : vector<16x32xf32>
    %cst_101 = arith.constant 0.000000e+00 : f32
    %354 = vector.broadcast %cst_101 : f32 to vector<16x32xf32>
    %355 = arith.maximumf %353, %354 : vector<16x32xf32>
    %356 = vector.broadcast %13 : vector<1x32xf32> to vector<16x32xf32>
    %357 = arith.mulf %355, %356 : vector<16x32xf32>
    %cst_102 = arith.constant dense<0.000000e+00> : vector<16xf32>
    %358 = vector.multi_reduction <add>, %357, %cst_102 [1] : vector<16x32xf32> to vector<16xf32>
    %359 = vector.shape_cast %358 : vector<16xf32> to vector<16x1xf32>
    %360 = vector.broadcast %14 : vector<1x1xf32> to vector<16x1xf32>
    %361 = arith.addf %359, %360 : vector<16x1xf32>
    %c7_i32 = arith.constant 7 : i32
    %362 = vector.broadcast %c7_i32 : i32 to vector<16x8xi32>
    %363 = arith.cmpi eq, %11, %362 : vector<16x8xi32>
    %364 = vector.shape_cast %361 : vector<16x1xf32> to vector<16x1xf32>
    %365 = vector.broadcast %364 : vector<16x1xf32> to vector<16x8xf32>
    %366 = arith.select %363, %365, %322 : vector<16x8xi1>, vector<16x8xf32>
    %c0_103 = arith.constant 0 : index
    %c0_104 = arith.constant 0 : index
    %367 = vector.load %arg11[%c0_103, %c0_104] : memref<16x32xf32, #tpu.memory_space<vmem>>, vector<16x32xf32>
    tpu.vector_store %arg11[%c0_103, %c0_104], %353 {strides = array<i32>} : memref<16x32xf32, #tpu.memory_space<vmem>>, vector<16x32xf32>,
    %c0_105 = arith.constant 0 : index
    %c0_106 = arith.constant 0 : index
    %c0_107 = arith.constant 0 : index
    %368 = vector.load %arg10[%c0_105, %c0_106, %c0_107] : memref<1x16x8xf32, #tpu.memory_space<vmem>>, vector<1x16x8xf32>
    %369 = vector.shape_cast %368 : vector<1x16x8xf32> to vector<16x8xf32>
    %370 = vector.shape_cast %366 : vector<16x8xf32> to vector<1x16x8xf32>
    tpu.vector_store %arg10[%c0_105, %c0_106, %c0_107], %370 {strides = array<i32>} : memref<1x16x8xf32, #tpu.memory_space<vmem>>, vector<1x16x8xf32>,
    return
  }
  func.func @transform_0(%arg0: i32, %arg1: i32) -> (i32, i32) {
    %c0_i32 = arith.constant 0 : i32
    %c0_i32_0 = arith.constant 0 : i32
    return %arg0, %c0_i32 : i32, i32
  }
  func.func @transform_1(%arg0: i32, %arg1: i32) -> (i32, i32, i32) {
    %c0_i32 = arith.constant 0 : i32
    %c0_i32_0 = arith.constant 0 : i32
    %c0_i32_1 = arith.constant 0 : i32
    return %arg1, %c0_i32, %c0_i32_0 : i32, i32, i32
  }
  func.func @transform_2(%arg0: i32, %arg1: i32) -> (i32, i32) {
    %c0_i32 = arith.constant 0 : i32
    %c0_i32_0 = arith.constant 0 : i32
    return %arg0, %c0_i32 : i32, i32
  }
  func.func @transform_3(%arg0: i32, %arg1: i32) -> (i32, i32) {
    %c0_i32 = arith.constant 0 : i32
    %c0_i32_0 = arith.constant 0 : i32
    %c0_i32_1 = arith.constant 0 : i32
    return %c0_i32, %c0_i32_0 : i32, i32
  }
  func.func @transform_4(%arg0: i32, %arg1: i32) -> (i32, i32) {
    %c0_i32 = arith.constant 0 : i32
    %c0_i32_0 = arith.constant 0 : i32
    %c0_i32_1 = arith.constant 0 : i32
    return %c0_i32, %c0_i32_0 : i32, i32
  }
  func.func @transform_5(%arg0: i32, %arg1: i32) -> (i32, i32) {
    %c0_i32 = arith.constant 0 : i32
    %c0_i32_0 = arith.constant 0 : i32
    %c0_i32_1 = arith.constant 0 : i32
    return %c0_i32, %c0_i32_0 : i32, i32
  }
  func.func @transform_6(%arg0: i32, %arg1: i32) -> (i32, i32) {
    %c0_i32 = arith.constant 0 : i32
    %c0_i32_0 = arith.constant 0 : i32
    %c0_i32_1 = arith.constant 0 : i32
    return %c0_i32, %c0_i32_0 : i32, i32
  }
  func.func @transform_7(%arg0: i32, %arg1: i32) -> (i32, i32) {
    %c0_i32 = arith.constant 0 : i32
    %c0_i32_0 = arith.constant 0 : i32
    %c0_i32_1 = arith.constant 0 : i32
    return %c0_i32, %c0_i32_0 : i32, i32
  }
  func.func @transform_8(%arg0: i32, %arg1: i32) -> (i32, i32, i32) {
    %c0_i32 = arith.constant 0 : i32
    %c0_i32_0 = arith.constant 0 : i32
    return %arg1, %arg0, %c0_i32 : i32, i32, i32
  }
  func.func @transform_9(%arg0: i32, %arg1: i32) -> (i32, i32) {
    %c0_i32 = arith.constant 0 : i32
    %c0_i32_0 = arith.constant 0 : i32
    return %arg0, %c0_i32 : i32, i32
  }
}

</mosaic_0001>

<bundles_post_ra>
// kernel: tile.8
= control target key start
LH: loop header
LB: loop body
LE: loop exit
PB: predicated region body
PF: predicated region fallthrough
CT: control target
= control target key end

     0   :  { %s22_s0 = inlined_call_operand.vmem [shape: f32[128], index: 0, kind: input, shape index: {}]   ;;  %s23_s1 = inlined_call_operand.vmem [shape: f32[8,128], index: 1, kind: output, shape index: {}]  }
   0x1   :  { %v4_v0 = vld [vmem:[%s22_s0] ss:$0 sm:$0xff] }
   0x2   :  { %5 = vst [vmem:[%s23_s1] sm:$0xff] %v4_v0 }

// kernel: tgcn_forward_sequence.1
= control target key start
LH: loop header
LB: loop body
LE: loop exit
PB: predicated region body
PF: predicated region fallthrough
CT: control target
= control target key end

     0   :  { %s2613_s0 = inlined_call_operand.vmem [shape: bf16[16,16], index: 0, kind: input, shape index: {}]   ;;  %s2614_s1 = inlined_call_operand.vmem [shape: bf16[1,16,1024], index: 1, kind: input, shape index: {}]   ;;  %s2615_s2 = inlined_call_operand.vmem [shape: f32[16,32], index: 2, kind: input, shape index: {}]   ;;  %s2616_s3 = inlined_call_operand.vmem [shape: f32[1,1024], index: 3, kind: input, shape index: {}]   ;;  %s2617_s4 = inlined_call_operand.vmem [shape: bf16[32,64], index: 4, kind: input, shape index: {}]   ;;  %s2618_s5 = inlined_call_operand.vmem [shape: bf16[32,32], index: 5, kind: input, shape index: {}]   ;;  %s2619_s6 = inlined_call_operand.vmem [shape: f32[1,32], index: 6, kind: input, shape index: {}]   ;;  %s2620_s7 = inlined_call_operand.<no memory space> [shape: f32[1,1], index: 7, kind: input, shape index: {}]   ;;  %s2621_s8 = inlined_call_operand.vmem [shape: f32[1,16,8], index: 8, kind: output, shape index: {0}]   ;;  %s2622_s9 = inlined_call_operand.hbm [shape: f32[16,32], index: 9, kind: output, shape index: {1}]  }
   0x1   :  { %v15_v0 = vstv %s2620_s7 }
   0x2   :  { %16 = vst [vmem:[#allocation2] sm:$0x1] %v15_v0 }
   0x3   :  { %v48_v1 = vld [vmem:[%s2614_s1] sm:$0xff]  ;;  %v2091_v5 = vmov 0   ;;  %v50_v6 = vld [vmem:[%s2614_s1 + $0x10] sm:$0xff]  ;;  %vm41_vm0 = vcmask 261120   ;;  %vm143_vm1 = vcmask 130048   ;;  %v40_v12 = vld [vmem:[%s2615_s2 + $0x8] sm:$0xff] }
   0x4   :  { %v52_v2 = vld [vmem:[%s2614_s1 + $0x20] sm:$0xff]  ;;  %179 = vmatprep.mubr.bf16.mxu0 %v2091_v5  ;;  %222 = vmatprep.mubr.bf16.mxu1 %v2091_v5  ;;  %v54_v7 = vld [vmem:[%s2614_s1 + $0x30] sm:$0xff]  ;;  %43 = vst.msk [vmem:[#allocation3 + $0x8] sm:$0xff] %vm41_vm0, %v40_v12 }
   0x5   :  { %v1731_v3 = vcombine.high %v48_v1, %v52_v2  ;;  %v1730_v4 = vcombine.low %v48_v1, %v52_v2  ;;  %1964 = vset.pattern.permute.xlu1 %v2091_v5  ;;  %1965 = vset.pattern.permute.xlu0 %v2091_v5  ;;  %v1966_v8 = vld [vmem:[%s2613_s0] sm:$0xff]   ;;  %v1735_v9 = vcombine.high %v50_v6, %v54_v7 }
   0x6   :  { %v1734_v10 = vcombine.low %v50_v6, %v54_v7  ;;  %v39_v11 = vld [vmem:[%s2615_s2] sm:$0xff] }
   0x7   :  { %147 = vmatprep.subr.bf16.mxu0 %v1731_v3  ;;  %42 = vst.msk [vmem:[#allocation3] sm:$0xff] %vm41_vm0, %v39_v11 }
   0x8   :  { %148 = vmatpush1.bf16.msra.mxu0 %v1730_v4 }
   0x9   :  { %233 = vmatprep.subr.bf16.mxu0 %v1735_v9 }
   0xa   :  { %17 = vsyncpa [#allocation4], 0  ;;  %v2092_v13 = vmov 0.0   ;;  %v2180_v14 = vld [vmem:[%s2617_s4] sm:$0xff]   ;;  %v2187_v15 = vld [vmem:[%s2617_s4 + $0x8] sm:$0xff]   ;;  %vm2093_vm2 = vmmov 0   ;;  %v58_v27 = vlaneseq }
   0xb   :  { %1738 = vmatmul.mubr.msk.bf16.vlgmr.msra.gmra.mrb[0].mxu0 %vm143_vm1, %v1966_v8  ;;  %v2193_v17 = vld [vmem:[#allocation3 + $0x8] sm:$0xff]  ;;  %v51_v21 = vld [vmem:[%s2614_s1 + $0x18] sm:$0xff]  ;;  %v2235_v34 = vld [vmem:[%s2616_s3] sm:$0xff]  ;;  %s2094_s16 = smov 96  }
   0xc   :  { %234 = vmatpush1.bf16.msra.mxu0 %v1734_v10  ;;  %265 = vmatprep.mubr.bf16.mxu0 %v2091_v5  ;;  %v49_v19 = vld [vmem:[%s2614_s1 + $0x8] sm:$0xff]  ;;  %v55_v24 = vld [vmem:[%s2614_s1 + $0x38] sm:$0xff]  ;;  %v2227_v31 = vshrl.u32 %v58_v27, 7  ;;  %v2249_v51 = vld [vmem:[%s2618_s5] sm:$0xff]  }
   0xd   :  { %1828 = vmatprep.subr.bf16.mxu0 %v2092_v13  ;;  %v53_v20 = vld [vmem:[%s2614_s1 + $0x28] sm:$0xff]  ;;  %v1737_v25 = vcombine.high %v51_v21, %v55_v24  ;;  %v1736_v26 = vcombine.low %v51_v21, %v55_v24 }
   0xe   :  { %v2191_v16 = vld [vmem:[#allocation3] sm:$0xff]  ;;  %v1733_v22 = vcombine.high %v49_v19, %v53_v20  ;;  %v1732_v23 = vcombine.low %v49_v19, %v53_v20  ;;  %v60_v33 = vsub.s32 0, %v2227_v31 }
   0xf   :  { %v323_v18 = vpack.c.bf16 %v2193_v17, %v2191_v16  ;;  %v2256_v55 = vld [vmem:[%s2618_s5 + $0x8] sm:$0xff]   ;;  %s2095_s5 = smov 64  }
  0x10   :  { %190 = vmatprep.subr.bf16.mxu1 %v1733_v22  ;;  %v61_v38 = vrot.slane %v2235_v34, %v60_v33 }
  0x11   :  { %191 = vmatpush1.bf16.msra.mxu1 %v1732_v23 }
  0x12   :  { %276 = vmatprep.subr.bf16.mxu1 %v1737_v25 }
  0x13   :  { %1740 = vmatmul.mubr.msk.bf16.vlgmr.msra.gmra.mrb[4].mxu0 %vm143_vm1, %v1966_v8 }
  0x14   :  { %1829 = vmatpush3.bf16.msra.mxu0 %v2180_v14  ;;  %1832 = vmatprep.mubr.msk.bf16.mxu0 %vm2093_vm2, %v2092_v13 }
  0x15   :  { %1830 = vmatprep.subr.bf16.mxu0 %v2092_v13  ;;  %1739 = vmatmul.mubr.msk.bf16.vlgmr.msra.gmra.mrb[0].mxu1 %vm143_vm1, %v1966_v8 }
  0x16   :  { %277 = vmatpush1.bf16.msra.mxu1 %v1736_v26  ;;  %308 = vmatprep.mubr.bf16.mxu1 %v2091_v5 }
  0x17   :  { %1836 = vmatprep.subr.bf16.mxu1 %v2092_v13 }
  0x18   :  { %1831 = vmatpush3.bf16.msra.mxu0 %v2187_v15 }
  0x19   :  { %1844 = vmatprep.subr.bf16.mxu0 %v2092_v13 }
  0x1b   :  { %1833 = vmatmul.mubr.msk.bf16.vlgmr.msra.gmra.mrb[8].mxu0 %vm41_vm0, %v323_v18 }
  0x1c   :  { %1845 = vmatpush3.bf16.msra.mxu0 %v2180_v14  ;;  %1848 = vmatprep.mubr.msk.bf16.mxu0 %vm2093_vm2, %v2092_v13 }
  0x1d   :  { %1846 = vmatprep.subr.bf16.mxu0 %v2092_v13  ;;  %1741 = vmatmul.mubr.msk.bf16.vlgmr.msra.gmra.mrb[4].mxu1 %vm143_vm1, %v1966_v8 }
  0x1e   :  { %1840 = vmatprep.mubr.msk.bf16.mxu1 %vm2093_vm2, %v2092_v13  ;;  %1837 = vmatpush3.bf16.msra.mxu1 %v2249_v51 }
  0x1f   :  { %1838 = vmatprep.subr.bf16.mxu1 %v2092_v13 }
  0x20   :  { %1847 = vmatpush3.bf16.msra.mxu0 %v2187_v15 }
  0x21   :  { %1860 = vmatprep.subr.bf16.mxu0 %v2092_v13 }
  0x22   :  { %1839 = vmatpush3.bf16.msra.mxu1 %v2256_v55 }
  0x23   :  { %1852 = vmatprep.subr.bf16.mxu1 %v2092_v13 }
  0xde   :  { %v181_v28 = vpop.f32.mrb[0].mxu0 }
  0xdf   :  { %v2224_v29 = vpop.f32.mrb[1].mxu0  ;;  %v182_v40 = vadd.f32 %v181_v28, %v61_v38 }
  0xe0   :  { %v185_v30 = vpop.f32.mrb[2].mxu0 }
  0xe1   :  { %v2229_v32 = vpop.f32.mrb[3].mxu0  ;;  %v186_v42 = vadd.f32 %v185_v30, %v61_v38 }
  0xe6   :  { %v2237_v35 = vpop.f32.mrb[4].mxu0 }
  0xe7   :  { %v2239_v36 = vpop.f32.mrb[5].mxu0 }
  0xe8   :  { %v2241_v37 = vpop.f32.mrb[6].mxu0  ;;  %v2262_v58 = vpop.f32.mrb[0].mxu1 }
  0xe9   :  { %v2244_v39 = vpop.f32.mrb[7].mxu0  ;;  %v2264_v59 = vpop.f32.mrb[1].mxu1 }
  0xea   :  { %v2266_v60 = vpop.f32.mrb[2].mxu1 }
  0xeb   :  { %v2268_v61 = vpop.f32.mrb[3].mxu1 }
  0xee   :  { %v378_v41 = vpop.f32.mrb[8].mxu0 }
  0xef   :  { %v385_v43 = vadd.f32 %v378_v41, %v182_v40  ;;  %v1834_v44 = vpop.f32.mrb[9].mxu0 }
  0xf0   :  { %v381_v45 = vpop.f32.mrb[10].mxu0  ;;  %v2270_v62 = vpop.f32.mrb[4].mxu1 }
  0xf1   :  { %v1745_v46 = vmul.f32 -1.442695, %v385_v43  ;;  %v386_v47 = vadd.f32 %v381_v45, %v186_v42  ;;  %v1835_v48 = vpop.f32.mrb[11].mxu0  ;;  %v2272_v63 = vpop.f32.mrb[5].mxu1 }
  0xf2   :  { %v2274_v0 = vpop.f32.mrb[6].mxu1 }
  0xf3   :  { %1971 = vpow2.f32 %v1745_v46  ;;  %v1746_v49 = vmul.f32 -1.442695, %v386_v47  ;;  %v2276_v1 = vpop.f32.mrb[7].mxu1 }
  0xf5   :  { %1973 = vpow2.f32 %v1746_v49 }
  0xfd   :  { %v1972_v50 = vpop.eup %1971 }
  0xfe   :  { %v393_v52 = vadd.f32 1.0, %v1972_v50 }
  0xff   :  { %v1974_v53 = vpop.eup %1973 }
 0x100   :  { %1975 = vrcp.f32 %v393_v52  ;;  %v394_v54 = vadd.f32 1.0, %v1974_v53 }
 0x102   :  { %1977 = vrcp.f32 %v394_v54 }
 0x10a   :  { %v1976_v56 = vpop.eup %1975 }
 0x10b   :  { %401 = vrot.lane.b32.xlu0 %v1976_v56, %s2094_s16  ;;  %v484_v23 = vsub.f32 1.0, %v1976_v56  ;;  %v482_v28 = vmul.f32 %v1976_v56, %v2191_v16 }
 0x10c   :  { %v1978_v57 = vpop.eup %1977 }
 0x10d   :  { %v485_v25 = vsub.f32 1.0, %v1978_v57  ;;  %v483_v30 = vmul.f32 %v1978_v57, %v2193_v17 }
 0x10f   :  { %403 = vrot.lane.b32.xlu0 %v1978_v57, %s2094_s16 }
 0x17d   :  { %v402_v2 = vpop.permute.xlu0 %401 }
 0x17e   :  { %v407_v4 = vmul.f32 %v402_v2, %v2191_v16  ;;  %v64_v16 = vsub.s32 1, %v2227_v31 }
 0x181   :  { %v404_v3 = vpop.permute.xlu0 %403 }
 0x182   :  { %v408_v5 = vmul.f32 %v404_v3, %v2193_v17  ;;  %v65_v17 = vrot.slane %v2235_v34, %v64_v16 }
 0x184   :  { %v409_v6 = vpack.c.bf16 %v408_v5, %v407_v4  ;;  %v188_v44 = vadd.f32 %v2229_v32, %v65_v17 }
 0x186   :  { %1841 = vmatmul.mubr.msk.bf16.vlgmr.msra.gmra.mrb[8].mxu1 %vm41_vm0, %v409_v6 }
 0x187   :  { %1853 = vmatpush3.bf16.msra.mxu1 %v2249_v51  ;;  %1856 = vmatprep.mubr.msk.bf16.mxu1 %vm2093_vm2, %v2092_v13 }
 0x188   :  { %1854 = vmatprep.subr.bf16.mxu1 %v2092_v13 }
 0x18b   :  { %1855 = vmatpush3.bf16.msra.mxu1 %v2256_v55 }
 0x18c   :  { %1868 = vmatprep.subr.bf16.mxu1 %v2092_v13 }
 0x259   :  { %v463_v7 = vpop.f32.mrb[8].mxu1 }
 0x25a   :  { %472 = vrot.lane.b32.xlu1 %v463_v7, %s2095_s5  ;;  %v1842_v8 = vpop.f32.mrb[9].mxu1 }
 0x25b   :  { %v466_v9 = vpop.f32.mrb[10].mxu1 }
 0x25c   :  { %v1843_v10 = vpop.f32.mrb[11].mxu1 }
 0x25e   :  { %474 = vrot.lane.b32.xlu1 %v466_v9, %s2095_s5 }
 0x2cc   :  { %v473_v11 = vpop.permute.xlu1 %472 }
 0x2cd   :  { %v478_v12 = vadd.f32 %v473_v11, %v182_v40 }
 0x2cf   :  { %1979 = vtanh.f32 %v478_v12 }
 0x2d0   :  { %v475_v18 = vpop.permute.xlu1 %474 }
 0x2d1   :  { %v479_v19 = vadd.f32 %v475_v18, %v186_v42  ;;  %v184_v42 = vadd.f32 %v2224_v29, %v65_v17 }
 0x2d3   :  { %1981 = vtanh.f32 %v479_v19 }
 0x2d9   :  { %v1980_v20 = vpop.eup %1979 }
 0x2da   :  { %488 = vrot.lane.b32.xlu0 %v1980_v20, %s2095_s5 }
 0x2dd   :  { %v1982_v21 = vpop.eup %1981 }
 0x2de   :  { %490 = vrot.lane.b32.xlu1 %v1982_v21, %s2095_s5 }
 0x34c   :  { %v489_v22 = vpop.permute.xlu0 %488 }
 0x34d   :  { %v494_v24 = vmul.f32 %v489_v22, %v484_v23 }
 0x34f   :  { %v2293_v38 = vadd.f32 %v494_v24, %v482_v28 }
 0x350   :  { %v491_v26 = vpop.permute.xlu1 %490 }
 0x351   :  { %v495_v33 = vmul.f32 %v491_v26, %v485_v25 }
 0x353   :  { %v2295_v40 = vadd.f32 %v495_v33, %v483_v30 }
 0x355   :  { %v535_v41 = vpack.c.bf16 %v2295_v40, %v2293_v38 }
 0x357   :  { %1849 = vmatmul.mubr.msk.bf16.vlgmr.msra.gmra.mrb[12].mxu0 %vm41_vm0, %v535_v41 }
 0x358   :  { %1861 = vmatpush3.bf16.msra.mxu0 %v2180_v14  ;;  %1864 = vmatprep.mubr.msk.bf16.mxu0 %vm2093_vm2, %v2092_v13 }
 0x359   :  { %1862 = vmatprep.subr.bf16.mxu0 %v2092_v13 }
 0x35c   :  { %1863 = vmatpush3.bf16.msra.mxu0 %v2187_v15 }
 0x35d   :  { %1876 = vmatprep.subr.bf16.mxu0 %v2092_v13 }
 0x42a   :  { %v573_v43 = vpop.f32.mrb[12].mxu0 }
 0x42b   :  { %v580_v45 = vadd.f32 %v573_v43, %v184_v42  ;;  %v1850_v46 = vpop.f32.mrb[13].mxu0 }
 0x42c   :  { %v576_v47 = vpop.f32.mrb[14].mxu0 }
 0x42d   :  { %v1753_v48 = vmul.f32 -1.442695, %v580_v45  ;;  %v581_v49 = vadd.f32 %v576_v47, %v188_v44  ;;  %v1851_v50 = vpop.f32.mrb[15].mxu0 }
 0x42f   :  { %1983 = vpow2.f32 %v1753_v48  ;;  %v1754_v52 = vmul.f32 -1.442695, %v581_v49 }
 0x431   :  { %1985 = vpow2.f32 %v1754_v52 }
 0x439   :  { %v1984_v53 = vpop.eup %1983 }
 0x43a   :  { %v588_v54 = vadd.f32 1.0, %v1984_v53 }
 0x43b   :  { %v1986_v56 = vpop.eup %1985 }
 0x43c   :  { %1987 = vrcp.f32 %v588_v54  ;;  %v589_v57 = vadd.f32 1.0, %v1986_v56 }
 0x43e   :  { %1989 = vrcp.f32 %v589_v57 }
 0x446   :  { %v1988_v2 = vpop.eup %1987 }
 0x447   :  { %596 = vrot.lane.b32.xlu0 %v1988_v2, %s2094_s16  ;;  %v663_v22 = vsub.f32 1.0, %v1988_v2  ;;  %v661_v28 = vmul.f32 %v1988_v2, %v2293_v38 }
 0x448   :  { %v1990_v29 = vpop.eup %1989 }
 0x449   :  { %598 = vrot.lane.b32.xlu1 %v1990_v29, %s2094_s16  ;;  %v664_v25 = vsub.f32 1.0, %v1990_v29  ;;  %v662_v30 = vmul.f32 %v1990_v29, %v2295_v40 }
 0x4b9   :  { %v597_v32 = vpop.permute.xlu0 %596 }
 0x4ba   :  { %v602_v4 = vmul.f32 %v597_v32, %v2293_v38 }
 0x4bb   :  { %v599_v3 = vpop.permute.xlu1 %598 }
 0x4bc   :  { %v603_v5 = vmul.f32 %v599_v3, %v2295_v40 }
 0x4be   :  { %v604_v6 = vpack.c.bf16 %v603_v5, %v602_v4 }
 0x4c0   :  { %1857 = vmatmul.mubr.msk.bf16.vlgmr.msra.gmra.mrb[12].mxu1 %vm41_vm0, %v604_v6 }
 0x4c1   :  { %1869 = vmatpush3.bf16.msra.mxu1 %v2249_v51  ;;  %1872 = vmatprep.mubr.msk.bf16.mxu1 %vm2093_vm2, %v2092_v13 }
 0x4c2   :  { %1870 = vmatprep.subr.bf16.mxu1 %v2092_v13 }
 0x4c5   :  { %1871 = vmatpush3.bf16.msra.mxu1 %v2256_v55 }
 0x4c6   :  { %1884 = vmatprep.subr.bf16.mxu1 %v2092_v13 }
 0x593   :  { %v642_v7 = vpop.f32.mrb[12].mxu1 }
 0x594   :  { %651 = vrot.lane.b32.xlu0 %v642_v7, %s2095_s5  ;;  %v1858_v8 = vpop.f32.mrb[13].mxu1 }
 0x595   :  { %v645_v9 = vpop.f32.mrb[14].mxu1 }
 0x596   :  { %653 = vrot.lane.b32.xlu1 %v645_v9, %s2095_s5  ;;  %v1859_v10 = vpop.f32.mrb[15].mxu1 }
 0x606   :  { %v652_v11 = vpop.permute.xlu0 %651 }
 0x607   :  { %v657_v12 = vadd.f32 %v652_v11, %v184_v42  ;;  %v68_v42 = vsub.s32 2, %v2227_v31 }
 0x608   :  { %v654_v18 = vpop.permute.xlu1 %653 }
 0x609   :  { %1991 = vtanh.f32 %v657_v12  ;;  %v658_v19 = vadd.f32 %v654_v18, %v188_v44  ;;  %v69_v43 = vrot.slane %v2235_v34, %v68_v42 }
 0x60b   :  { %1993 = vtanh.f32 %v658_v19  ;;  %v225_v44 = vadd.f32 %v2262_v58, %v69_v43  ;;  %v229_v46 = vadd.f32 %v2266_v60, %v69_v43 }
 0x613   :  { %v1992_v20 = vpop.eup %1991 }
 0x614   :  { %667 = vrot.lane.b32.xlu0 %v1992_v20, %s2095_s5 }
 0x615   :  { %v1994_v21 = vpop.eup %1993 }
 0x616   :  { %669 = vrot.lane.b32.xlu1 %v1994_v21, %s2095_s5 }
 0x686   :  { %v668_v23 = vpop.permute.xlu0 %667 }
 0x687   :  { %v673_v24 = vmul.f32 %v668_v23, %v663_v22 }
 0x688   :  { %v670_v26 = vpop.permute.xlu1 %669 }
 0x689   :  { %v674_v33 = vmul.f32 %v670_v26, %v664_v25  ;;  %v2327_v41 = vadd.f32 %v673_v24, %v661_v28 }
 0x68b   :  { %v2329_v16 = vadd.f32 %v674_v33, %v662_v30 }
 0x68d   :  { %v702_v17 = vpack.c.bf16 %v2329_v16, %v2327_v41 }
 0x68f   :  { %1865 = vmatmul.mubr.msk.bf16.vlgmr.msra.gmra.mrb[16].mxu0 %vm41_vm0, %v702_v17 }
 0x690   :  { %1877 = vmatpush3.bf16.msra.mxu0 %v2180_v14  ;;  %1880 = vmatprep.mubr.msk.bf16.mxu0 %vm2093_vm2, %v2092_v13 }
 0x691   :  { %1878 = vmatprep.subr.bf16.mxu0 %v2092_v13 }
 0x694   :  { %1879 = vmatpush3.bf16.msra.mxu0 %v2187_v15 }
 0x695   :  { %1892 = vmatprep.subr.bf16.mxu0 %v2092_v13 }
 0x762   :  { %v740_v45 = vpop.f32.mrb[16].mxu0 }
 0x763   :  { %v747_v47 = vadd.f32 %v740_v45, %v225_v44  ;;  %v1866_v48 = vpop.f32.mrb[17].mxu0 }
 0x764   :  { %v743_v49 = vpop.f32.mrb[18].mxu0 }
 0x765   :  { %v1757_v50 = vmul.f32 -1.442695, %v747_v47  ;;  %v748_v52 = vadd.f32 %v743_v49, %v229_v46  ;;  %v1867_v53 = vpop.f32.mrb[19].mxu0 }
 0x767   :  { %1995 = vpow2.f32 %v1757_v50  ;;  %v1758_v54 = vmul.f32 -1.442695, %v748_v52 }
 0x769   :  { %1997 = vpow2.f32 %v1758_v54 }
 0x771   :  { %v1996_v56 = vpop.eup %1995 }
 0x772   :  { %v755_v57 = vadd.f32 1.0, %v1996_v56 }
 0x773   :  { %v1998_v2 = vpop.eup %1997 }
 0x774   :  { %1999 = vrcp.f32 %v755_v57  ;;  %v756_v29 = vadd.f32 1.0, %v1998_v2 }
 0x776   :  { %2001 = vrcp.f32 %v756_v29 }
 0x77e   :  { %v2000_v32 = vpop.eup %1999 }
 0x77f   :  { %763 = vrot.lane.b32.xlu0 %v2000_v32, %s2094_s16  ;;  %v830_v22 = vsub.f32 1.0, %v2000_v32  ;;  %v828_v28 = vmul.f32 %v2000_v32, %v2327_v41 }
 0x780   :  { %v2002_v58 = vpop.eup %2001 }
 0x781   :  { %765 = vrot.lane.b32.xlu1 %v2002_v58, %s2094_s16  ;;  %v831_v25 = vsub.f32 1.0, %v2002_v58  ;;  %v829_v30 = vmul.f32 %v2002_v58, %v2329_v16 }
 0x7f1   :  { %v764_v60 = vpop.permute.xlu0 %763 }
 0x7f2   :  { %v769_v4 = vmul.f32 %v764_v60, %v2327_v41 }
 0x7f3   :  { %v766_v3 = vpop.permute.xlu1 %765 }
 0x7f4   :  { %v770_v5 = vmul.f32 %v766_v3, %v2329_v16 }
 0x7f6   :  { %v771_v6 = vpack.c.bf16 %v770_v5, %v769_v4 }
 0x7f8   :  { %1873 = vmatmul.mubr.msk.bf16.vlgmr.msra.gmra.mrb[16].mxu1 %vm41_vm0, %v771_v6 }
 0x7f9   :  { %1885 = vmatpush3.bf16.msra.mxu1 %v2249_v51  ;;  %1888 = vmatprep.mubr.msk.bf16.mxu1 %vm2093_vm2, %v2092_v13 }
 0x7fa   :  { %1886 = vmatprep.subr.bf16.mxu1 %v2092_v13 }
 0x7fd   :  { %1887 = vmatpush3.bf16.msra.mxu1 %v2256_v55 }
 0x7fe   :  { %1900 = vmatprep.subr.bf16.mxu1 %v2092_v13 }
 0x8cb   :  { %v809_v7 = vpop.f32.mrb[16].mxu1 }
 0x8cc   :  { %818 = vrot.lane.b32.xlu0 %v809_v7, %s2095_s5  ;;  %v1874_v8 = vpop.f32.mrb[17].mxu1 }
 0x8cd   :  { %v812_v9 = vpop.f32.mrb[18].mxu1 }
 0x8ce   :  { %820 = vrot.lane.b32.xlu1 %v812_v9, %s2095_s5  ;;  %v1875_v10 = vpop.f32.mrb[19].mxu1 }
 0x93e   :  { %v819_v11 = vpop.permute.xlu0 %818 }
 0x93f   :  { %v824_v12 = vadd.f32 %v819_v11, %v225_v44  ;;  %v72_v44 = vsub.s32 3, %v2227_v31 }
 0x940   :  { %v821_v18 = vpop.permute.xlu1 %820 }
 0x941   :  { %2003 = vtanh.f32 %v824_v12  ;;  %v825_v19 = vadd.f32 %v821_v18, %v229_v46  ;;  %v73_v45 = vrot.slane %v2235_v34, %v72_v44 }
 0x943   :  { %2005 = vtanh.f32 %v825_v19  ;;  %v227_v46 = vadd.f32 %v2264_v59, %v73_v45  ;;  %v231_v48 = vadd.f32 %v2268_v61, %v73_v45 }
 0x94b   :  { %v2004_v20 = vpop.eup %2003 }
 0x94c   :  { %834 = vrot.lane.b32.xlu0 %v2004_v20, %s2095_s5 }
 0x94d   :  { %v2006_v21 = vpop.eup %2005 }
 0x94e   :  { %836 = vrot.lane.b32.xlu1 %v2006_v21, %s2095_s5 }
 0x9be   :  { %v835_v23 = vpop.permute.xlu0 %834 }
 0x9bf   :  { %v840_v24 = vmul.f32 %v835_v23, %v830_v22 }
 0x9c0   :  { %v837_v26 = vpop.permute.xlu1 %836 }
 0x9c1   :  { %v841_v33 = vmul.f32 %v837_v26, %v831_v25  ;;  %v2361_v17 = vadd.f32 %v840_v24, %v828_v28 }
 0x9c3   :  { %v2363_v42 = vadd.f32 %v841_v33, %v829_v30 }
 0x9c5   :  { %v869_v43 = vpack.c.bf16 %v2363_v42, %v2361_v17 }
 0x9c7   :  { %1881 = vmatmul.mubr.msk.bf16.vlgmr.msra.gmra.mrb[20].mxu0 %vm41_vm0, %v869_v43 }
 0x9c8   :  { %1893 = vmatpush3.bf16.msra.mxu0 %v2180_v14  ;;  %1896 = vmatprep.mubr.msk.bf16.mxu0 %vm2093_vm2, %v2092_v13 }
 0x9c9   :  { %1894 = vmatprep.subr.bf16.mxu0 %v2092_v13 }
 0x9cc   :  { %1895 = vmatpush3.bf16.msra.mxu0 %v2187_v15 }
 0x9cd   :  { %1908 = vmatprep.subr.bf16.mxu0 %v2092_v13 }
 0xa9a   :  { %v907_v47 = vpop.f32.mrb[20].mxu0 }
 0xa9b   :  { %v914_v49 = vadd.f32 %v907_v47, %v227_v46  ;;  %v1882_v50 = vpop.f32.mrb[21].mxu0 }
 0xa9c   :  { %v910_v52 = vpop.f32.mrb[22].mxu0 }
 0xa9d   :  { %v1761_v53 = vmul.f32 -1.442695, %v914_v49  ;;  %v915_v54 = vadd.f32 %v910_v52, %v231_v48  ;;  %v1883_v56 = vpop.f32.mrb[23].mxu0 }
 0xa9f   :  { %2007 = vpow2.f32 %v1761_v53  ;;  %v1762_v57 = vmul.f32 -1.442695, %v915_v54 }
 0xaa1   :  { %2009 = vpow2.f32 %v1762_v57 }
 0xaa9   :  { %v2008_v2 = vpop.eup %2007 }
 0xaaa   :  { %v922_v29 = vadd.f32 1.0, %v2008_v2 }
 0xaab   :  { %v2010_v32 = vpop.eup %2009 }
 0xaac   :  { %2011 = vrcp.f32 %v922_v29  ;;  %v923_v58 = vadd.f32 1.0, %v2010_v32 }
 0xaae   :  { %2013 = vrcp.f32 %v923_v58 }
 0xab6   :  { %v2012_v60 = vpop.eup %2011 }
 0xab7   :  { %930 = vrot.lane.b32.xlu0 %v2012_v60, %s2094_s16  ;;  %v997_v22 = vsub.f32 1.0, %v2012_v60  ;;  %v995_v28 = vmul.f32 %v2012_v60, %v2361_v17 }
 0xab8   :  { %v2014_v59 = vpop.eup %2013 }
 0xab9   :  { %932 = vrot.lane.b32.xlu1 %v2014_v59, %s2094_s16  ;;  %v998_v25 = vsub.f32 1.0, %v2014_v59  ;;  %v996_v30 = vmul.f32 %v2014_v59, %v2363_v42 }
 0xb29   :  { %v931_v61 = vpop.permute.xlu0 %930 }
 0xb2a   :  { %v936_v4 = vmul.f32 %v931_v61, %v2361_v17 }
 0xb2b   :  { %v933_v3 = vpop.permute.xlu1 %932 }
 0xb2c   :  { %v937_v5 = vmul.f32 %v933_v3, %v2363_v42 }
 0xb2e   :  { %v938_v6 = vpack.c.bf16 %v937_v5, %v936_v4 }
 0xb30   :  { %1889 = vmatmul.mubr.msk.bf16.vlgmr.msra.gmra.mrb[20].mxu1 %vm41_vm0, %v938_v6 }
 0xb31   :  { %1901 = vmatpush3.bf16.msra.mxu1 %v2249_v51  ;;  %1904 = vmatprep.mubr.msk.bf16.mxu1 %vm2093_vm2, %v2092_v13 }
 0xb32   :  { %1902 = vmatprep.subr.bf16.mxu1 %v2092_v13 }
 0xb35   :  { %1903 = vmatpush3.bf16.msra.mxu1 %v2256_v55 }
 0xb36   :  { %1916 = vmatprep.subr.bf16.mxu1 %v2092_v13 }
 0xc03   :  { %v976_v7 = vpop.f32.mrb[20].mxu1 }
 0xc04   :  { %985 = vrot.lane.b32.xlu0 %v976_v7, %s2095_s5  ;;  %v1890_v8 = vpop.f32.mrb[21].mxu1 }
 0xc05   :  { %v979_v9 = vpop.f32.mrb[22].mxu1 }
 0xc06   :  { %987 = vrot.lane.b32.xlu1 %v979_v9, %s2095_s5  ;;  %v1891_v10 = vpop.f32.mrb[23].mxu1 }
 0xc76   :  { %v986_v11 = vpop.permute.xlu0 %985 }
 0xc77   :  { %v991_v12 = vadd.f32 %v986_v11, %v227_v46  ;;  %v76_v46 = vsub.s32 4, %v2227_v31 }
 0xc78   :  { %v988_v18 = vpop.permute.xlu1 %987 }
 0xc79   :  { %2015 = vtanh.f32 %v991_v12  ;;  %v992_v19 = vadd.f32 %v988_v18, %v231_v48  ;;  %v77_v47 = vrot.slane %v2235_v34, %v76_v46 }
 0xc7b   :  { %2017 = vtanh.f32 %v992_v19  ;;  %v268_v48 = vadd.f32 %v2237_v35, %v77_v47  ;;  %v272_v50 = vadd.f32 %v2241_v37, %v77_v47 }
 0xc83   :  { %v2016_v20 = vpop.eup %2015 }
 0xc84   :  { %1001 = vrot.lane.b32.xlu0 %v2016_v20, %s2095_s5 }
 0xc85   :  { %v2018_v21 = vpop.eup %2017 }
 0xc86   :  { %1003 = vrot.lane.b32.xlu1 %v2018_v21, %s2095_s5 }
 0xcf6   :  { %v1002_v23 = vpop.permute.xlu0 %1001 }
 0xcf7   :  { %v1007_v24 = vmul.f32 %v1002_v23, %v997_v22 }
 0xcf8   :  { %v1004_v26 = vpop.permute.xlu1 %1003 }
 0xcf9   :  { %v1008_v33 = vmul.f32 %v1004_v26, %v998_v25  ;;  %v2395_v43 = vadd.f32 %v1007_v24, %v995_v28 }
 0xcfb   :  { %v2397_v44 = vadd.f32 %v1008_v33, %v996_v30 }
 0xcfd   :  { %v1036_v45 = vpack.c.bf16 %v2397_v44, %v2395_v43 }
 0xcff   :  { %1897 = vmatmul.mubr.msk.bf16.vlgmr.msra.gmra.mrb[24].mxu0 %vm41_vm0, %v1036_v45 }
 0xd00   :  { %1909 = vmatpush3.bf16.msra.mxu0 %v2180_v14  ;;  %1912 = vmatprep.mubr.msk.bf16.mxu0 %vm2093_vm2, %v2092_v13 }
 0xd01   :  { %1910 = vmatprep.subr.bf16.mxu0 %v2092_v13 }
 0xd04   :  { %1911 = vmatpush3.bf16.msra.mxu0 %v2187_v15 }
 0xd05   :  { %1924 = vmatprep.subr.bf16.mxu0 %v2092_v13 }
 0xdd2   :  { %v1074_v49 = vpop.f32.mrb[24].mxu0 }
 0xdd3   :  { %v1081_v52 = vadd.f32 %v1074_v49, %v268_v48  ;;  %v1898_v53 = vpop.f32.mrb[25].mxu0 }
 0xdd4   :  { %v1077_v54 = vpop.f32.mrb[26].mxu0 }
 0xdd5   :  { %v1765_v56 = vmul.f32 -1.442695, %v1081_v52  ;;  %v1082_v57 = vadd.f32 %v1077_v54, %v272_v50  ;;  %v1899_v2 = vpop.f32.mrb[27].mxu0 }
 0xdd7   :  { %2019 = vpow2.f32 %v1765_v56  ;;  %v1766_v29 = vmul.f32 -1.442695, %v1082_v57 }
 0xdd9   :  { %2021 = vpow2.f32 %v1766_v29 }
 0xde1   :  { %v2020_v32 = vpop.eup %2019 }
 0xde2   :  { %v1089_v58 = vadd.f32 1.0, %v2020_v32 }
 0xde3   :  { %v2022_v60 = vpop.eup %2021 }
 0xde4   :  { %2023 = vrcp.f32 %v1089_v58  ;;  %v1090_v59 = vadd.f32 1.0, %v2022_v60 }
 0xde6   :  { %2025 = vrcp.f32 %v1090_v59 }
 0xdee   :  { %v2024_v61 = vpop.eup %2023 }
 0xdef   :  { %1097 = vrot.lane.b32.xlu0 %v2024_v61, %s2094_s16  ;;  %v1164_v22 = vsub.f32 1.0, %v2024_v61  ;;  %v1162_v28 = vmul.f32 %v2024_v61, %v2395_v43 }
 0xdf0   :  { %v2026_v35 = vpop.eup %2025 }
 0xdf1   :  { %1099 = vrot.lane.b32.xlu1 %v2026_v35, %s2094_s16  ;;  %v1165_v25 = vsub.f32 1.0, %v2026_v35  ;;  %v1163_v30 = vmul.f32 %v2026_v35, %v2397_v44 }
 0xe61   :  { %v1098_v37 = vpop.permute.xlu0 %1097 }
 0xe62   :  { %v1103_v4 = vmul.f32 %v1098_v37, %v2395_v43 }
 0xe63   :  { %v1100_v3 = vpop.permute.xlu1 %1099 }
 0xe64   :  { %v1104_v5 = vmul.f32 %v1100_v3, %v2397_v44 }
 0xe66   :  { %v1105_v6 = vpack.c.bf16 %v1104_v5, %v1103_v4 }
 0xe68   :  { %1905 = vmatmul.mubr.msk.bf16.vlgmr.msra.gmra.mrb[24].mxu1 %vm41_vm0, %v1105_v6 }
 0xe69   :  { %1917 = vmatpush3.bf16.msra.mxu1 %v2249_v51  ;;  %1920 = vmatprep.mubr.msk.bf16.mxu1 %vm2093_vm2, %v2092_v13 }
 0xe6a   :  { %1918 = vmatprep.subr.bf16.mxu1 %v2092_v13 }
 0xe6d   :  { %1919 = vmatpush3.bf16.msra.mxu1 %v2256_v55 }
 0xe6e   :  { %1932 = vmatprep.subr.bf16.mxu1 %v2092_v13 }
 0xf3b   :  { %v1143_v7 = vpop.f32.mrb[24].mxu1 }
 0xf3c   :  { %1152 = vrot.lane.b32.xlu0 %v1143_v7, %s2095_s5  ;;  %v1906_v8 = vpop.f32.mrb[25].mxu1 }
 0xf3d   :  { %v1146_v9 = vpop.f32.mrb[26].mxu1 }
 0xf3e   :  { %1154 = vrot.lane.b32.xlu1 %v1146_v9, %s2095_s5  ;;  %v1907_v10 = vpop.f32.mrb[27].mxu1 }
 0xfae   :  { %v1153_v11 = vpop.permute.xlu0 %1152 }
 0xfaf   :  { %v1158_v12 = vadd.f32 %v1153_v11, %v268_v48  ;;  %v80_v48 = vsub.s32 5, %v2227_v31 }
 0xfb0   :  { %v1155_v18 = vpop.permute.xlu1 %1154 }
 0xfb1   :  { %2027 = vtanh.f32 %v1158_v12  ;;  %v1159_v19 = vadd.f32 %v1155_v18, %v272_v50  ;;  %v81_v49 = vrot.slane %v2235_v34, %v80_v48 }
 0xfb3   :  { %2029 = vtanh.f32 %v1159_v19  ;;  %v270_v50 = vadd.f32 %v2239_v36, %v81_v49  ;;  %v274_v53 = vadd.f32 %v2244_v39, %v81_v49 }
 0xfbb   :  { %v2028_v20 = vpop.eup %2027 }
 0xfbc   :  { %1168 = vrot.lane.b32.xlu0 %v2028_v20, %s2095_s5 }
 0xfbd   :  { %v2030_v21 = vpop.eup %2029 }
 0xfbe   :  { %1170 = vrot.lane.b32.xlu1 %v2030_v21, %s2095_s5 }
0x102e   :  { %v1169_v23 = vpop.permute.xlu0 %1168 }
0x102f   :  { %v1174_v24 = vmul.f32 %v1169_v23, %v1164_v22 }
0x1030   :  { %v1171_v26 = vpop.permute.xlu1 %1170 }
0x1031   :  { %v1175_v33 = vmul.f32 %v1171_v26, %v1165_v25  ;;  %v2429_v45 = vadd.f32 %v1174_v24, %v1162_v28 }
0x1033   :  { %v2431_v46 = vadd.f32 %v1175_v33, %v1163_v30 }
0x1035   :  { %v1203_v47 = vpack.c.bf16 %v2431_v46, %v2429_v45 }
0x1037   :  { %1913 = vmatmul.mubr.msk.bf16.vlgmr.msra.gmra.mrb[28].mxu0 %vm41_vm0, %v1203_v47 }
0x1038   :  { %1925 = vmatpush3.bf16.msra.mxu0 %v2180_v14  ;;  %1928 = vmatprep.mubr.msk.bf16.mxu0 %vm2093_vm2, %v2092_v13 }
0x1039   :  { %1926 = vmatprep.subr.bf16.mxu0 %v2092_v13 }
0x103c   :  { %1927 = vmatpush3.bf16.msra.mxu0 %v2187_v15 }
0x103d   :  { %1940 = vmatprep.subr.bf16.mxu0 %v2092_v13 }
0x110a   :  { %v1241_v52 = vpop.f32.mrb[28].mxu0 }
0x110b   :  { %v1248_v54 = vadd.f32 %v1241_v52, %v270_v50  ;;  %v1914_v56 = vpop.f32.mrb[29].mxu0 }
0x110c   :  { %v1244_v57 = vpop.f32.mrb[30].mxu0 }
0x110d   :  { %v1769_v2 = vmul.f32 -1.442695, %v1248_v54  ;;  %v1249_v29 = vadd.f32 %v1244_v57, %v274_v53  ;;  %v1915_v32 = vpop.f32.mrb[31].mxu0 }
0x110f   :  { %2031 = vpow2.f32 %v1769_v2  ;;  %v1770_v58 = vmul.f32 -1.442695, %v1249_v29 }
0x1111   :  { %2033 = vpow2.f32 %v1770_v58 }
0x1119   :  { %v2032_v60 = vpop.eup %2031 }
0x111a   :  { %v1256_v59 = vadd.f32 1.0, %v2032_v60 }
0x111b   :  { %v2034_v61 = vpop.eup %2033 }
0x111c   :  { %2035 = vrcp.f32 %v1256_v59  ;;  %v1257_v35 = vadd.f32 1.0, %v2034_v61 }
0x111e   :  { %2037 = vrcp.f32 %v1257_v35 }
0x1126   :  { %v2036_v37 = vpop.eup %2035 }
0x1127   :  { %1264 = vrot.lane.b32.xlu0 %v2036_v37, %s2094_s16  ;;  %v1331_v22 = vsub.f32 1.0, %v2036_v37  ;;  %v1329_v28 = vmul.f32 %v2036_v37, %v2429_v45 }
0x1128   :  { %v2038_v36 = vpop.eup %2037 }
0x1129   :  { %1266 = vrot.lane.b32.xlu1 %v2038_v36, %s2094_s16  ;;  %v1332_v25 = vsub.f32 1.0, %v2038_v36  ;;  %v1330_v30 = vmul.f32 %v2038_v36, %v2431_v46 }
0x1199   :  { %v1265_v39 = vpop.permute.xlu0 %1264 }
0x119a   :  { %v1270_v4 = vmul.f32 %v1265_v39, %v2429_v45 }
0x119b   :  { %v1267_v3 = vpop.permute.xlu1 %1266 }
0x119c   :  { %v1271_v5 = vmul.f32 %v1267_v3, %v2431_v46 }
0x119e   :  { %v1272_v6 = vpack.c.bf16 %v1271_v5, %v1270_v4 }
0x11a0   :  { %1921 = vmatmul.mubr.msk.bf16.vlgmr.msra.gmra.mrb[28].mxu1 %vm41_vm0, %v1272_v6 }
0x11a1   :  { %1933 = vmatpush3.bf16.msra.mxu1 %v2249_v51  ;;  %1936 = vmatprep.mubr.msk.bf16.mxu1 %vm2093_vm2, %v2092_v13 }
0x11a2   :  { %1934 = vmatprep.subr.bf16.mxu1 %v2092_v13 }
0x11a5   :  { %1935 = vmatpush3.bf16.msra.mxu1 %v2256_v55 }
0x11a6   :  { %1948 = vmatprep.subr.bf16.mxu1 %v2092_v13 }
0x1273   :  { %v1310_v7 = vpop.f32.mrb[28].mxu1 }
0x1274   :  { %1319 = vrot.lane.b32.xlu0 %v1310_v7, %s2095_s5  ;;  %v1922_v8 = vpop.f32.mrb[29].mxu1 }
0x1275   :  { %v1313_v9 = vpop.f32.mrb[30].mxu1 }
0x1276   :  { %1321 = vrot.lane.b32.xlu1 %v1313_v9, %s2095_s5  ;;  %v1923_v10 = vpop.f32.mrb[31].mxu1 }
0x12e6   :  { %v1320_v11 = vpop.permute.xlu0 %1319 }
0x12e7   :  { %v1325_v12 = vadd.f32 %v1320_v11, %v270_v50  ;;  %v84_v50 = vsub.s32 6, %v2227_v31 }
0x12e8   :  { %v1322_v18 = vpop.permute.xlu1 %1321 }
0x12e9   :  { %2039 = vtanh.f32 %v1325_v12  ;;  %v1326_v19 = vadd.f32 %v1322_v18, %v274_v53  ;;  %v85_v52 = vrot.slane %v2235_v34, %v84_v50 }
0x12eb   :  { %2041 = vtanh.f32 %v1326_v19  ;;  %v311_v53 = vadd.f32 %v2270_v62, %v85_v52  ;;  %v315_v56 = vadd.f32 %v2274_v0, %v85_v52 }
0x12f3   :  { %v2040_v20 = vpop.eup %2039 }
0x12f4   :  { %1335 = vrot.lane.b32.xlu0 %v2040_v20, %s2095_s5 }
0x12f5   :  { %v2042_v21 = vpop.eup %2041 }
0x12f6   :  { %1337 = vrot.lane.b32.xlu1 %v2042_v21, %s2095_s5 }
0x1366   :  { %v1336_v23 = vpop.permute.xlu0 %1335 }
0x1367   :  { %v1341_v24 = vmul.f32 %v1336_v23, %v1331_v22 }
0x1368   :  { %v1338_v26 = vpop.permute.xlu1 %1337 }
0x1369   :  { %v1342_v33 = vmul.f32 %v1338_v26, %v1332_v25  ;;  %v2463_v47 = vadd.f32 %v1341_v24, %v1329_v28 }
0x136b   :  { %v2465_v48 = vadd.f32 %v1342_v33, %v1330_v30  ;;  %v88_v30 = vsub.s32 7, %v2227_v31 }
0x136d   :  { %v1370_v49 = vpack.c.bf16 %v2465_v48, %v2463_v47  ;;  %v89_v33 = vrot.slane %v2235_v34, %v88_v30 }
0x136f   :  { %1929 = vmatmul.mubr.msk.bf16.vlgmr.msra.gmra.mrb[32].mxu0 %vm41_vm0, %v1370_v49  ;;  %v2505_v49 = vadd.f32 %v2272_v63, %v89_v33  ;;  %v2508_v52 = vadd.f32 %v2276_v1, %v89_v33 }
0x1370   :  { %1941 = vmatpush3.bf16.msra.mxu0 %v2180_v14  ;;  %1944 = vmatprep.mubr.msk.bf16.mxu0 %vm2093_vm2, %v2092_v13 }
0x1371   :  { %1942 = vmatprep.subr.bf16.mxu0 %v2092_v13 }
0x1374   :  { %1943 = vmatpush3.bf16.msra.mxu0 %v2187_v15 }
0x1442   :  { %v1408_v54 = vpop.f32.mrb[32].mxu0 }
0x1443   :  { %v1415_v57 = vadd.f32 %v1408_v54, %v311_v53  ;;  %v1930_v2 = vpop.f32.mrb[33].mxu0 }
0x1444   :  { %v1411_v29 = vpop.f32.mrb[34].mxu0 }
0x1445   :  { %v1773_v14 = vmul.f32 -1.442695, %v1415_v57  ;;  %v1416_v32 = vadd.f32 %v1411_v29, %v315_v56  ;;  %v1931_v58 = vpop.f32.mrb[35].mxu0 }
0x1447   :  { %2043 = vpow2.f32 %v1773_v14  ;;  %v1774_v60 = vmul.f32 -1.442695, %v1416_v32 }
0x1449   :  { %2045 = vpow2.f32 %v1774_v60  ;;  %v498_v60 = vmax.f32 %v2293_v38, 0.0  ;;  %v677_v38 = vmax.f32 %v2327_v41, 0.0 }
0x1451   :  { %v2044_v59 = vpop.eup %2043 }
0x1452   :  { %v1423_v15 = vadd.f32 1.0, %v2044_v59  ;;  %v2524_v59 = vld [vmem:[%s2619_s6] ss:$0 sm:$0xff]  ;;  %s2096_s6 = smov [#allocation3]  }
0x1453   :  { %v2046_v61 = vpop.eup %2045  ;;  %s1716_s18 = sshll.u32 %s2096_s6, 4  ;;  %s1717_s18 = int_to_ptr.vmem [resolvable:$true] %s1716_s18 }
0x1454   :  { %2047 = vrcp.f32 %v1423_v15  ;;  %v1424_v35 = vadd.f32 1.0, %v2046_v61  ;;  %v506_v15 = vmul.f32 %v2524_v59, %v498_v60  ;;  %v678_v61 = vmax.f32 %v2329_v16, 0.0  ;;  %s2067_s19 = scalar_lea.vmem %s1717_s18, 256  ;;  %p2072_p1 = scmp.lt.s32.totalorder %s1717_s18, %s1717_s18 }
0x1455   :  { %p2068_p0 = scmp.ne.s32.totalorder %s1717_s18, %s2067_s19  ;;  %p2073_p2 = scmp.lt.s32.totalorder %s2067_s19, %s2067_s19 }
0x1456   :  { %2049 = vrcp.f32 %v1424_v35  ;;  %v499_v35 = vmax.f32 %v2295_v40, 0.0 }
0x1457   :  { %p2074_p3 = por %p2073_p2, %p2072_p1 }
0x1459   :  { %p2075_p4 = pnand %p2074_p3, %p2068_p0 }
0x145e   :  { %v2048_v37 = vpop.eup %2047 }
0x145f   :  { %1431 = vrot.lane.b32.xlu0 %v2048_v37, %s2094_s16  ;;  %v1496_v22 = vmul.f32 %v2048_v37, %v2463_v47 }
0x1460   :  { %v2050_v62 = vpop.eup %2049 }
0x1461   :  { %1433 = vrot.lane.b32.xlu1 %v2050_v62, %s2094_s16  ;;  %v1499_v20 = vsub.f32 1.0, %v2050_v62  ;;  %v1497_v23 = vmul.f32 %v2050_v62, %v2465_v48  ;;  %v680_v62 = vmul.f32 %v2524_v59, %v678_v61 }
0x14d1   :  { %v1432_v0 = vpop.permute.xlu0 %1431 }
0x14d2   :  { %v1437_v39 = vmul.f32 %v1432_v0, %v2463_v47  ;;  %v507_v0 = vmul.f32 %v2524_v59, %v499_v35 }
0x14d3   :  { %v1434_v36 = vpop.permute.xlu1 %1433 }
0x14d4   :  { %v1438_v3 = vmul.f32 %v1434_v36, %v2465_v48  ;;  %v684_v36 = vsel %vm41_vm0, %v680_v62, 0.0 }
0x14d6   :  { %v1439_v4 = vpack.c.bf16 %v1438_v3, %v1437_v39  ;;  %v511_v39 = vsel %vm41_vm0, %v507_v0, 0.0  ;;  %v679_v3 = vmul.f32 %v2524_v59, %v677_v38 }
0x14d8   :  { %1937 = vmatmul.mubr.msk.bf16.vlgmr.msra.gmra.mrb[32].mxu1 %vm41_vm0, %v1439_v4  ;;  %v681_v16 = vsel %vm41_vm0, %v679_v3, 0.0 }
0x14d9   :  { %1949 = vmatpush3.bf16.msra.mxu1 %v2249_v51  ;;  %1952 = vmatprep.mubr.msk.bf16.mxu1 %vm2093_vm2, %v2092_v13 }
0x14da   :  { %1950 = vmatprep.subr.bf16.mxu1 %v2092_v13 }
0x14dd   :  { %1951 = vmatpush3.bf16.msra.mxu1 %v2256_v55  ;;  %v1498_v55 = vsub.f32 1.0, %v2048_v37  ;;  %v508_v37 = vsel %vm41_vm0, %v506_v15, 0.0 }
0x15ab   :  { %v1477_v5 = vpop.f32.mrb[32].mxu1 }
0x15ac   :  { %1486 = vrot.lane.b32.xlu0 %v1477_v5, %s2095_s5  ;;  %v1938_v6 = vpop.f32.mrb[33].mxu1 }
0x15ad   :  { %v1480_v7 = vpop.f32.mrb[34].mxu1 }
0x15ae   :  { %1488 = vrot.lane.b32.xlu1 %v1480_v7, %s2095_s5  ;;  %v1939_v8 = vpop.f32.mrb[35].mxu1 }
0x161e   :  { %v1487_v9 = vpop.permute.xlu0 %1486 }
0x161f   :  { %v1492_v10 = vadd.f32 %v1487_v9, %v311_v53 }
0x1620   :  { %v1489_v11 = vpop.permute.xlu1 %1488 }
0x1621   :  { %2051 = vtanh.f32 %v1492_v10  ;;  %v1493_v51 = vadd.f32 %v1489_v11, %v315_v56  ;;  %v845_v11 = vmax.f32 %v2363_v42, 0.0 }
0x1623   :  { %2053 = vtanh.f32 %v1493_v51  ;;  %v847_v51 = vmul.f32 %v2524_v59, %v845_v11  ;;  %v1751_v11 = vld [vmem:[#allocation2] ss:$0 sm:$0xff] }
0x162b   :  { %v2052_v12 = vpop.eup %2051 }
0x162c   :  { %1502 = vrot.lane.b32.xlu0 %v2052_v12, %s2095_s5  ;;  %v1012_v12 = vmax.f32 %v2397_v44, 0.0 }
0x162d   :  { %v2054_v13 = vpop.eup %2053 }
0x162e   :  { %1504 = vrot.lane.b32.xlu1 %v2054_v13, %s2095_s5  ;;  %v844_v13 = vmax.f32 %v2361_v17, 0.0 }
0x169e   :  { %v1503_v18 = vpop.permute.xlu0 %1502 }
0x169f   :  { %v1508_v19 = vmul.f32 %v1503_v18, %v1498_v55  ;;  %v851_v55 = vsel %vm41_vm0, %v847_v51, 0.0  ;;  %v1014_v18 = vmul.f32 %v2524_v59, %v1012_v12 }
0x16a0   :  { %v1505_v21 = vpop.permute.xlu1 %1504 }
0x16a1   :  { %v1509_v24 = vmul.f32 %v1505_v21, %v1499_v20  ;;  %v2495_v25 = vadd.f32 %v1508_v19, %v1496_v22  ;;  %v846_v19 = vmul.f32 %v2524_v59, %v844_v13  ;;  %v1011_v20 = vmax.f32 %v2395_v43, 0.0 }
0x16a2   :  { %v1018_v21 = vsel %vm41_vm0, %v1014_v18, 0.0 }
0x16a3   :  { %v2497_v26 = vadd.f32 %v1509_v24, %v1497_v23  ;;  %v848_v42 = vsel %vm41_vm0, %v846_v19, 0.0  ;;  %v1013_v22 = vmul.f32 %v2524_v59, %v1011_v20 }
0x16a5   :  { %v1537_v28 = vpack.c.bf16 %v2497_v26, %v2495_v25  ;;  %v1015_v44 = vsel %vm41_vm0, %v1013_v22, 0.0 }
0x16a7   :  { %1945 = vmatmul.mubr.msk.bf16.vlgmr.msra.gmra.mrb[36].mxu0 %vm41_vm0, %v1537_v28 }
0x177a   :  { %v1575_v50 = vpop.f32.mrb[36].mxu0 }
0x177b   :  { %v1582_v53 = vadd.f32 %v1575_v50, %v2505_v49  ;;  %v1946_v54 = vpop.f32.mrb[37].mxu0 }
0x177c   :  { %v1578_v56 = vpop.f32.mrb[38].mxu0 }
0x177d   :  { %v1777_v57 = vmul.f32 -1.442695, %v1582_v53  ;;  %v1583_v2 = vadd.f32 %v1578_v56, %v2508_v52  ;;  %v1947_v29 = vpop.f32.mrb[39].mxu0  ;;  %v1179_v56 = vmax.f32 %v2431_v46, 0.0 }
0x177e   :  { %v1346_v29 = vmax.f32 %v2465_v48, 0.0 }
0x177f   :  { %2055 = vpow2.f32 %v1777_v57  ;;  %v1778_v14 = vmul.f32 -1.442695, %v1583_v2  ;;  %v1178_v57 = vmax.f32 %v2429_v45, 0.0  ;;  %v1181_v2 = vmul.f32 %v2524_v59, %v1179_v56 }
0x1780   :  { %v1512_v45 = vmax.f32 %v2495_v25, 0.0 }
0x1781   :  { %2057 = vpow2.f32 %v1778_v14  ;;  %v1345_v14 = vmax.f32 %v2463_v47, 0.0 }
0x1782   :  { %v1514_v60 = vmul.f32 %v2524_v59, %v1512_v45 }
0x1783   :  { %v1347_v46 = vmul.f32 %v2524_v59, %v1345_v14 }
0x1784   :  { %v1516_v61 = vsel %vm41_vm0, %v1514_v60, 0.0 }
0x1785   :  { %v1349_v47 = vsel %vm41_vm0, %v1347_v46, 0.0 }
0x1789   :  { %v2056_v31 = vpop.eup %2055 }
0x178a   :  { %v1590_v34 = vadd.f32 1.0, %v2056_v31  ;;  %v1348_v31 = vmul.f32 %v2524_v59, %v1346_v29 }
0x178b   :  { %v2058_v32 = vpop.eup %2057 }
0x178c   :  { %2059 = vrcp.f32 %v1590_v34  ;;  %v1591_v63 = vadd.f32 1.0, %v2058_v32  ;;  %v1513_v34 = vmax.f32 %v2497_v26, 0.0  ;;  %v1352_v48 = vsel %vm41_vm0, %v1348_v31, 0.0 }
0x178e   :  { %2061 = vrcp.f32 %v1591_v63  ;;  %v1515_v63 = vmul.f32 %v2524_v59, %v1513_v34 }
0x1790   :  { %v1519_v15 = vsel %vm41_vm0, %v1515_v63, 0.0 }
0x1796   :  { %v2512_v58 = vpop.eup %2059 }
0x1797   :  { %1598 = vrot.lane.b32.xlu0 %v2512_v58, %s2094_s16  ;;  %v1665_v38 = vsub.f32 1.0, %v2512_v58 }
0x1798   :  { %v2516_v1 = vpop.eup %2061 }
0x1799   :  { %1600 = vrot.lane.b32.xlu1 %v2516_v1, %s2094_s16 }
0x17b6   :  { %509 = vadd.xlane.f32.xlu0 %v508_v37 }
0x17ba   :  { %685 = vadd.xlane.f32.xlu0 %v684_v36 }
0x17bd   :  { %512 = vadd.xlane.f32.xlu1 %v511_v39  ;;  %v1663_v39 = vmul.f32 %v2512_v58, %v2495_v25 }
0x17c1   :  { %682 = vadd.xlane.f32.xlu1 %v681_v16  ;;  %v1666_v16 = vsub.f32 1.0, %v2516_v1 }
0x1809   :  { %v1599_v40 = vpop.permute.xlu0 %1598 }
0x180a   :  { %v1604_v5 = vmul.f32 %v1599_v40, %v2495_v25 }
0x180b   :  { %v1601_v4 = vpop.permute.xlu1 %1600 }
0x180c   :  { %v1605_v6 = vmul.f32 %v1601_v4, %v2497_v26 }
0x180e   :  { %v1606_v7 = vpack.c.bf16 %v1605_v6, %v1604_v5  ;;  %v1664_v5 = vmul.f32 %v2516_v1, %v2497_v26 }
0x1810   :  { %1953 = vmatmul.mubr.msk.bf16.vlgmr.msra.gmra.mrb[36].mxu1 %vm41_vm0, %v1606_v7 }
0x1843   :  { %v2554_v17 = vpop.xlane.xlu0 %509 }
0x1844   :  { %v520_v51 = vadd.f32 %v1751_v11, %v2554_v17 }
0x1847   :  { %v2556_v24 = vpop.xlane.xlu0 %685 }
0x1848   :  { %v688_v12 = vadd.f32 %v1751_v11, %v2556_v24 }
0x184a   :  { %v513_v23 = vpop.xlane.xlu1 %512 }
0x184b   :  { %v521_v26 = vadd.f32 %v1751_v11, %v513_v23 }
0x184e   :  { %v683_v28 = vpop.xlane.xlu1 %682 }
0x184f   :  { %v687_v1 = vadd.f32 %v1751_v11, %v683_v28 }
0x18e3   :  { %v1644_v41 = vpop.f32.mrb[36].mxu1 }
0x18e4   :  { %1653 = vrot.lane.b32.xlu0 %v1644_v41, %s2095_s5  ;;  %v1954_v8 = vpop.f32.mrb[37].mxu1 }
0x18e5   :  { %v1647_v9 = vpop.f32.mrb[38].mxu1 }
0x18e6   :  { %1655 = vrot.lane.b32.xlu1 %v1647_v9, %s2095_s5  ;;  %v1955_v10 = vpop.f32.mrb[39].mxu1 }
0x1903   :  { %852 = vadd.xlane.f32.xlu0 %v851_v55 }
0x1907   :  { %1019 = vadd.xlane.f32.xlu0 %v1018_v21 }
0x190a   :  { %849 = vadd.xlane.f32.xlu1 %v848_v42 }
0x190e   :  { %1016 = vadd.xlane.f32.xlu1 %v1015_v44 }
0x1956   :  { %v1654_v30 = vpop.permute.xlu0 %1653 }
0x1957   :  { %v1659_v43 = vadd.f32 %v1654_v30, %v2505_v49  ;;  %v1180_v49 = vmul.f32 %v2524_v59, %v1178_v57 }
0x1958   :  { %v1656_v33 = vpop.permute.xlu1 %1655 }
0x1959   :  { %2063 = vtanh.f32 %v1659_v43  ;;  %v1660_v50 = vadd.f32 %v1656_v33, %v2508_v52  ;;  %v1185_v52 = vsel %vm41_vm0, %v1181_v2, 0.0  ;;  %v1182_v32 = vsel %vm41_vm0, %v1180_v49, 0.0 }
0x195b   :  { %2065 = vtanh.f32 %v1660_v50 }
0x1963   :  { %v2064_v53 = vpop.eup %2063 }
0x1964   :  { %1669 = vrot.lane.b32.xlu1 %v2064_v53, %s2095_s5 }
0x1965   :  { %v2066_v54 = vpop.eup %2065 }
0x1966   :  { %1671 = vrot.lane.b32.xlu0 %v2066_v54, %s2095_s5 }
0x1985   :  { %1186 = vadd.xlane.f32.xlu0 %v1185_v52 }
0x1988   :  { %1183 = vadd.xlane.f32.xlu1 %v1182_v32 }
0x1989   :  { %1353 = vadd.xlane.f32.xlu0 %v1352_v48 }
0x198c   :  { %1350 = vadd.xlane.f32.xlu1 %v1349_v47 }
0x198d   :  { %1520 = vadd.xlane.f32.xlu0 %v1519_v15 }
0x1990   :  { %1517 = vadd.xlane.f32.xlu1 %v1516_v61  ;;  %v853_v37 = vpop.xlane.xlu0 %852 }
0x1991   :  { %v855_v13 = vadd.f32 %v1751_v11, %v853_v37 }
0x1994   :  { %v1020_v0 = vpop.xlane.xlu0 %1019 }
0x1995   :  { %v1022_v18 = vadd.f32 %v1751_v11, %v1020_v0 }
0x1997   :  { %v850_v35 = vpop.xlane.xlu1 %849 }
0x1998   :  { %v854_v55 = vadd.f32 %v1751_v11, %v850_v35 }
0x199b   :  { %v1017_v62 = vpop.xlane.xlu1 %1016 }
0x19d6   :  { %v1670_v36 = vpop.permute.xlu1 %1669 }
0x19d7   :  { %v1675_v3 = vmul.f32 %v1670_v36, %v1665_v38 }
0x19d8   :  { %v1672_v40 = vpop.permute.xlu0 %1671 }
0x19d9   :  { %v1677_v4 = vadd.f32 %v1675_v3, %v1663_v39  ;;  %v1676_v6 = vmul.f32 %v1672_v40, %v1666_v16 }
0x19db   :  { %1704 = vst.msk [vmem:[#allocation3] sm:$0xff] %vm41_vm0, %v1677_v4  ;;  %v1678_v7 = vadd.f32 %v1676_v6, %v1664_v5  ;;  %v1679_v41 = vmax.f32 %v1677_v4, 0.0 }
0x19dd   :  { %1705 = vst.msk [vmem:[#allocation3 + $0x8] sm:$0xff] %vm41_vm0, %v1678_v7  ;;  %v1681_v8 = vmul.f32 %v2524_v59, %v1679_v41  ;;  %v1680_v9 = vmax.f32 %v1678_v7, 0.0 }
0x19df   :  { %v1683_v25 = vsel %vm41_vm0, %v1681_v8, 0.0  ;;  %v1682_v58 = vmul.f32 %v2524_v59, %v1680_v9  ;;  %v1021_v59 = vadd.f32 %v1751_v11, %v1017_v62 }
0x19e0   :  { %1684 = vadd.xlane.f32.xlu1 %v1683_v25 }
0x19e1   :  { %v1686_v10 = vsel %vm41_vm0, %v1682_v58, 0.0 }
0x19e2   :  { %1687 = vadd.xlane.f32.xlu0 %v1686_v10 }
0x19f1   :  { %530 = vperm.xlu1 %1964, %v521_v26  }
0x19f5   :  { %692 = vperm.xlu1 %1964, %v687_v1  }
0x19f8   :  { %525 = vperm.xlu0 %1965, %v520_v51  }
0x19f9   :  { %697 = vperm.xlu1 %1964, %v688_v12  }
0x19fc   :  { %864 = vperm.xlu0 %1965, %v855_v13  }
0x19fd   :  { %859 = vperm.xlu1 %1964, %v854_v55  }
0x1a01   :  { %1026 = vperm.xlu1 %1964, %v1021_v59  }
0x1a05   :  { %1031 = vperm.xlu1 %1964, %v1022_v18  }
0x1a12   :  { %v1187_v19 = vpop.xlane.xlu0 %1186 }
0x1a13   :  { %v1189_v20 = vadd.f32 %v1751_v11, %v1187_v19 }
0x1a15   :  { %v1184_v21 = vpop.xlane.xlu1 %1183  ;;  %1198 = vperm.xlu0 %1965, %v1189_v20  }
0x1a16   :  { %v1188_v42 = vadd.f32 %v1751_v11, %v1184_v21  ;;  %v1354_v22 = vpop.xlane.xlu0 %1353 }
0x1a17   :  { %v1356_v44 = vadd.f32 %v1751_v11, %v1354_v22 }
0x1a18   :  { %1193 = vperm.xlu1 %1964, %v1188_v42  }
0x1a19   :  { %v1351_v17 = vpop.xlane.xlu1 %1350  ;;  %1365 = vperm.xlu0 %1965, %v1356_v44  }
0x1a1a   :  { %v1355_v23 = vadd.f32 %v1751_v11, %v1351_v17  ;;  %v1521_v30 = vpop.xlane.xlu0 %1520 }
0x1a1b   :  { %v1523_v43 = vadd.f32 %v1751_v11, %v1521_v30 }
0x1a1c   :  { %1360 = vperm.xlu1 %1964, %v1355_v23  }
0x1a1d   :  { %v1518_v24 = vpop.xlane.xlu1 %1517 }
0x1a1e   :  { %v1522_v28 = vadd.f32 %v1751_v11, %v1518_v24 }
0x1a20   :  { %1527 = vperm.xlu1 %1964, %v1522_v28  }
0x1a24   :  { %1532 = vperm.xlu1 %1964, %v1523_v43  }
0x1a6d   :  { %v1685_v33 = vpop.xlane.xlu1 %1684 }
0x1a6e   :  { %v1689_v50 = vadd.f32 %v1751_v11, %v1685_v33 }
0x1a6f   :  { %v1688_v53 = vpop.xlane.xlu0 %1687 }
0x1a70   :  { %v1690_v54 = vadd.f32 %v1751_v11, %v1688_v53  ;;  %1694 = vperm.xlu0 %1965, %v1689_v50  }
0x1a72   :  { %1699 = vperm.xlu1 %1964, %v1690_v54  }
0x1a73   :  { %2078 = shalt.err (!%p2075_p4)
}
0x1a74   :  { %s2079_s22 = scalar_lea.hbm %s2622_s9, 256 }
0x1a75   :  { %p2080_p5 = scmp.ne.s32.totalorder %s2622_s9, %s2079_s22  ;;  %p2083_p6 = scmp.lt.u32.totalorder %s2079_s22, %s2622_s9 }
0x1a77   :  { %p2085_p7 = pnand %p2083_p6, %p2080_p5 }
0x1a79   :  { %2088 = shalt.err (!%p2085_p7)
}
0x1a7a   :  { %s2097_s25 = smov 128   ;;  %s2098_s4 = smov 8   ;;  %v531_v56 = vpop.permute.xlu1 %530  ;;  %v526_v52 = vpop.permute.xlu0 %525  ;;  %v320_v46 = vand.u32 127, %v58_v27  ;;  %vm1706_vm11 = vcmask 64512  }
0x1a7b   :  { %1722 = dma.vmem_to_hbm [thread:$0]  %s1717_s18, 256, %s2622_s9, [#allocation4], %s2097_s25, %s2097_s25, %s2098_s4  }
0x1a7c   :  { %vm522_vm3 = vcmp.eq.s32.totalorder %v320_v46, 0  ;;  %vm689_vm4 = vcmp.eq.s32.totalorder %v320_v46, 1  ;;  %vm1023_vm5 = vcmp.eq.s32.totalorder %v320_v46, 3  ;;  %vm856_vm6 = vcmp.eq.s32.totalorder %v320_v46, 2 }
0x1a7d   :  { %v533_v48 = vsel %vm522_vm3, %v526_v52, 0.0  ;;  %v534_v47 = vsel %vm522_vm3, %v531_v56, 0.0  ;;  %vm1190_vm7 = vcmp.eq.s32.totalorder %v320_v46, 4  ;;  %vm1524_vm8 = vcmp.eq.s32.totalorder %v320_v46, 6 }
0x1a7e   :  { %v693_v57 = vpop.permute.xlu1 %692  ;;  %v865_v34 = vpop.permute.xlu0 %864  ;;  %vm1357_vm9 = vcmp.eq.s32.totalorder %v320_v46, 5  ;;  %vm1691_vm10 = vcmp.eq.s32.totalorder %v320_v46, 7 }
0x1a7f   :  { %v700_v60 = vsel %vm689_vm4, %v693_v57, %v533_v48 }
0x1a82   :  { %v698_v2 = vpop.permute.xlu1 %697 }
0x1a83   :  { %v701_v15 = vsel %vm689_vm4, %v698_v2, %v534_v47 }
0x1a84   :  { %v868_v62 = vsel %vm856_vm6, %v865_v34, %v701_v15 }
0x1a86   :  { %v860_v29 = vpop.permute.xlu1 %859 }
0x1a87   :  { %v867_v61 = vsel %vm856_vm6, %v860_v29, %v700_v60 }
0x1a8a   :  { %v1027_v49 = vpop.permute.xlu1 %1026 }
0x1a8b   :  { %v1034_v37 = vsel %vm1023_vm5, %v1027_v49, %v867_v61 }
0x1a8e   :  { %v1032_v14 = vpop.permute.xlu1 %1031 }
0x1a8f   :  { %v1035_v27 = vsel %vm1023_vm5, %v1032_v14, %v868_v62 }
0x1a94   :  { %v1199_v45 = vpop.permute.xlu0 %1198 }
0x1a95   :  { %v1202_v39 = vsel %vm1190_vm7, %v1199_v45, %v1035_v27 }
0x1a97   :  { %v1194_v31 = vpop.permute.xlu1 %1193 }
0x1a98   :  { %v1366_v35 = vpop.permute.xlu0 %1365  ;;  %v1201_v0 = vsel %vm1190_vm7, %v1194_v31, %v1034_v37 }
0x1a99   :  { %v1369_v40 = vsel %vm1357_vm9, %v1366_v35, %v1202_v39 }
0x1a9b   :  { %v1361_v32 = vpop.permute.xlu1 %1360 }
0x1a9c   :  { %v1368_v36 = vsel %vm1357_vm9, %v1361_v32, %v1201_v0 }
0x1a9f   :  { %v1528_v63 = vpop.permute.xlu1 %1527 }
0x1aa0   :  { %v1535_v3 = vsel %vm1524_vm8, %v1528_v63, %v1368_v36 }
0x1aa3   :  { %v1533_v38 = vpop.permute.xlu1 %1532 }
0x1aa4   :  { %v1536_v5 = vsel %vm1524_vm8, %v1533_v38, %v1369_v40 }
0x1aef   :  { %v1695_v16 = vpop.permute.xlu0 %1694 }
0x1af0   :  { %v1702_v4 = vsel %vm1691_vm10, %v1695_v16, %v1535_v3 }
0x1af1   :  { %1707 = vst.msk [vmem:[%s2621_s8] sm:$0xff] %vm1706_vm11, %v1702_v4  ;;  %v1700_v6 = vpop.permute.xlu1 %1699 }
0x1af2   :  { %v1703_v7 = vsel %vm1691_vm10, %v1700_v6, %v1536_v5 }
0x1af3   :  { %1708 = vst.msk [vmem:[%s2621_s8 + $0x8] sm:$0xff] %vm1706_vm11, %v1703_v7 }
0x1af4   :  { %2089 = dma.done.wait [#allocation4], 256  }
0x1af5   :  { %2090 = vsyncadd [#allocation4], 4294967040 }
0x1af6   :  { %1728 = vsyncpa [#allocation4], 1 }

</bundles_post_ra>
